<compile_context>
chip_gen: v5e
topology: v5e:2x2
jax: 0.10.0
libtpu: 0.0.40
codegen_flags: <defaults>
</compile_context>

<pallas_src>
import numpy as np
import jax
import jax.numpy as jnp
from jax import lax
from jax.experimental import pallas as pl
from jax.experimental.pallas import tpu as pltpu

N = 256           # vector length (batch of scalar predictions per loss eval)
W = 0.1           # MSE weight from CCLoss.__init__(w=0.1)
STRIP = 8         # sublane strip height for the pairwise-comparison sweep
NSTRIP = N // STRIP
OUT_LANES = 128   # lane-dense output tile
HANDLE_TIES = False  # True -> exact scipy average-rank ties (2x loop VALU ops)


def _pearson_centered(a_c, b_c):
    """Pearson r from already-centered (1, N) rows; lane reductions + EUP rsqrt."""
    sab = jnp.sum(a_c * b_c, axis=1, keepdims=True)
    saa = jnp.sum(a_c * a_c, axis=1, keepdims=True)
    sbb = jnp.sum(b_c * b_c, axis=1, keepdims=True)
    return sab * lax.rsqrt(saa * sbb)                       # (1, 1)


def ccloss_kernel(out_ref, lab_ref, col_ref, res_ref):
    x = out_ref[0]                       # (1, N) predictions
    y = lab_ref[0]                       # (1, N) labels
    nf = jnp.float32(N)

    # ---- MSE (mean reduction, like nn.MSELoss default) ----------------------
    d = x - y
    mse = jnp.sum(d * d, axis=1, keepdims=True) / nf        # (1, 1)

    # ---- Pearson r on raw values (centered moments; f32-cancellation safe) --
    xc = x - jnp.sum(x, axis=1, keepdims=True) / nf
    yc = y - jnp.sum(y, axis=1, keepdims=True) / nf
    r1 = _pearson_centered(yc, xc)                           # (1, 1)

    # ---- Ranks via strip-mined pairwise comparisons --------------------------
    # Compared values j live on sublanes (strips of the (N, 2) column slab);
    # rank targets i live on lanes.  Accumulate per-strip scores into an
    # (STRIP, N) accumulator, fold over sublanes once at the end.
    xb = jnp.broadcast_to(x, (STRIP, N))    # hoisted sublane broadcasts
    yb = jnp.broadcast_to(y, (STRIP, N))

    def body(k, carry):
        acc_x, acc_y = carry
        start = pl.multiple_of(k * STRIP, STRIP)
        strip = col_ref[0, pl.ds(start, STRIP), :]           # (STRIP, 2)
        cx = strip[:, 0:1]                                   # (STRIP, 1) preds
        cy = strip[:, 1:2]                                   # (STRIP, 1) labels
        if HANDLE_TIES:
            # score = (v_j < v_i) + (v_j <= v_i)  (scipy average ranks)
            sx = (cx < xb).astype(jnp.float32) + (cx <= xb).astype(jnp.float32)
            sy = (cy < yb).astype(jnp.float32) + (cy <= yb).astype(jnp.float32)
        else:
            # score = (v_j < v_i)  (exact when there are no ties)
            sx = (cx < xb).astype(jnp.float32)
            sy = (cy < yb).astype(jnp.float32)
        return acc_x + sx, acc_y + sy

    zeros = jnp.zeros((STRIP, N), jnp.float32)
    acc_x, acc_y = lax.fori_loop(0, NSTRIP, body, (zeros, zeros), unroll=True)

    score_x = jnp.sum(acc_x, axis=0, keepdims=True)          # (1, N)
    score_y = jnp.sum(acc_y, axis=0, keepdims=True)          # (1, N)

    # Centered ranks (Pearson is shift/scale invariant, constants fold):
    #   ties path:    rank - mean = 0.5 * (score - N)
    #   no-ties path: rank - mean = score - (N - 1)/2
    center = jnp.float32(N) if HANDLE_TIES else jnp.float32((N - 1) * 0.5)
    r2 = _pearson_centered(score_y - center, score_x - center)   # (1, 1)

    # ---- Combined loss, packed into one lane-dense output tile ---------------
    loss = mse * jnp.float32(W) - (r1 * r1 + r2)

    lane = lax.broadcasted_iota(jnp.int32, (1, OUT_LANES), 1)
    res_ref[0] = (jnp.where(lane == 0, loss, 0.0)
                  + jnp.where(lane == 1, r1, 0.0)
                  + jnp.where(lane == 2, r2, 0.0))


@jax.jit
def _ccloss_batched(out, labels):
    out = out.astype(jnp.float32)
    labels = labels.astype(jnp.float32)
    B = out.shape[0]

    rows_o = out.reshape(B, 1, N)                    # (B, 1, N)
    rows_l = labels.reshape(B, 1, N)                 # (B, 1, N)
    cols = jnp.stack([out, labels], axis=-1)         # (B, N, 2) column slab

    cost = pl.CostEstimate(
        flops=int(B * (4 * N * N + 32 * N)),
        transcendentals=int(2 * B),
        bytes_accessed=int(B * (2 * N + 2 * N + OUT_LANES) * 4),
    )

    res = pl.pallas_call(
        ccloss_kernel,
        grid=(B,),
        in_specs=[
            pl.BlockSpec((1, 1, N), lambda b: (b, 0, 0)),
            pl.BlockSpec((1, 1, N), lambda b: (b, 0, 0)),
            pl.BlockSpec((1, N, 2), lambda b: (b, 0, 0)),
        ],
        out_specs=pl.BlockSpec((1, 1, OUT_LANES), lambda b: (b, 0, 0)),
        out_shape=jax.ShapeDtypeStruct((B, 1, OUT_LANES), jnp.float32),
        compiler_params=pltpu.CompilerParams(
            dimension_semantics=("parallel",)),
        cost_estimate=cost,
    )(rows_o, rows_l, cols)

    res = res[:, 0, :]
    return res[:, 0], res[:, 1], res[:, 2]


def ccloss(out_vec, labels_vec):
    """CCLoss.forward.  Accepts a single (N,) pair (module semantics) or a
    batched (B, N) stack of pairs; returns (loss, r1, r2) per pair."""
    out_vec = jnp.asarray(out_vec)
    labels_vec = jnp.asarray(labels_vec)
    if out_vec.ndim == 1:
        loss, r1, r2 = _ccloss_batched(out_vec[None, :], labels_vec[None, :])
        return loss[0], r1[0], r2[0]
    return _ccloss_batched(out_vec, labels_vec)


def _ref_ccloss(out_vec, labels_vec):
    """Pure NumPy reference with scipy semantics (average ranks for ties)."""
    o = np.asarray(out_vec, np.float64)
    l = np.asarray(labels_vec, np.float64)
    mse = np.mean((o - l) ** 2)

    def pear(a, b):
        a = a - a.mean()
        b = b - b.mean()
        return float((a * b).sum() / np.sqrt((a * a).sum() * (b * b).sum()))

    def avg_rank(v):
        less = (v[None, :] < v[:, None]).sum(axis=1)
        leq = (v[None, :] <= v[:, None]).sum(axis=1)
        return 0.5 * (less + leq) + 0.5

    r1 = pear(l, o)
    r2 = pear(avg_rank(l), avg_rank(o))
    loss = mse * W - (r1 ** 2 + r2)
    return loss, r1, r2


if __name__ == "__main__":
    key = jax.random.PRNGKey(0)
    k1, k2 = jax.random.split(key)
    B = 4
    # Correlated "predictions" and "labels" so r1/r2 are non-trivial.
    labels = jax.random.normal(k1, (B, N), dtype=jnp.float32)
    out = labels + 0.5 * jax.random.normal(k2, (B, N), dtype=jnp.float32)

    # Batched path (one pallas_call, grid=(B,), parallel batch axis).
    loss, r1, r2 = ccloss(out, labels)
    jax.block_until_ready((loss, r1, r2))

    for i in range(B):
        ref_loss, ref_r1, ref_r2 = _ref_ccloss(out[i], labels[i])
        assert np.allclose(float(loss[i]), ref_loss, atol=1e-3), (i, float(loss[i]), ref_loss)
        assert np.allclose(float(r1[i]), ref_r1, atol=1e-3), (i, float(r1[i]), ref_r1)
        assert np.allclose(float(r2[i]), ref_r2, atol=1e-3), (i, float(r2[i]), ref_r2)

    # Single-pair path (original module call signature).
    l0, a0, b0 = ccloss(out[0], labels[0])
    jax.block_until_ready((l0, a0, b0))
    assert np.allclose(float(l0), float(loss[0]), atol=1e-5)
    assert np.allclose(float(a0), float(r1[0]), atol=1e-5)
    assert np.allclose(float(b0), float(r2[0]), atol=1e-5)

    print("KERNEL_OK")
</pallas_src>

<mosaic_0001>
module attributes {stable_mosaic.version = 11 : i64} {
  func.func @ccloss_kernel(%arg0: i32, %arg1: memref<1x1x256xf32, #tpu.memory_space<vmem>>, %arg2: memref<1x1x256xf32, #tpu.memory_space<vmem>>, %arg3: memref<1x256x2xf32, #tpu.memory_space<vmem>>, %arg4: memref<1x1x128xf32, #tpu.memory_space<vmem>>) attributes {dimension_semantics = [#tpu.dimension_semantics<parallel>], iteration_bounds = array<i64: 4>, scalar_prefetch = 0 : i64, scratch_operands = 0 : i64, tpu.core_type = #tpu.core_type<tc>, window_params = [{transform_indices = @transform_0, window_bounds = array<i64: 1, 1, 256>}, {transform_indices = @transform_1, window_bounds = array<i64: 1, 1, 256>}, {transform_indices = @transform_2, window_bounds = array<i64: 1, 256, 2>}, {transform_indices = @transform_3, window_bounds = array<i64: 1, 1, 128>}]} {
    %c0 = arith.constant 0 : index
    %c0_0 = arith.constant 0 : index
    %c0_1 = arith.constant 0 : index
    %0 = vector.load %arg1[%c0, %c0_0, %c0_1] : memref<1x1x256xf32, #tpu.memory_space<vmem>>, vector<1x1x256xf32>
    %1 = vector.shape_cast %0 : vector<1x1x256xf32> to vector<1x256xf32>
    %c0_2 = arith.constant 0 : index
    %c0_3 = arith.constant 0 : index
    %c0_4 = arith.constant 0 : index
    %2 = vector.load %arg2[%c0_2, %c0_3, %c0_4] : memref<1x1x256xf32, #tpu.memory_space<vmem>>, vector<1x1x256xf32>
    %3 = vector.shape_cast %2 : vector<1x1x256xf32> to vector<1x256xf32>
    %4 = arith.subf %1, %3 : vector<1x256xf32>
    %5 = arith.mulf %4, %4 : vector<1x256xf32>
    %cst = arith.constant dense<0.000000e+00> : vector<1xf32>
    %6 = vector.multi_reduction <add>, %5, %cst [1] : vector<1x256xf32> to vector<1xf32>
    %7 = vector.shape_cast %6 : vector<1xf32> to vector<1x1xf32>
    %cst_5 = arith.constant 2.560000e+02 : f32
    %8 = vector.broadcast %cst_5 : f32 to vector<1x1xf32>
    %9 = arith.divf %7, %8 : vector<1x1xf32>
    %cst_6 = arith.constant dense<0.000000e+00> : vector<1xf32>
    %10 = vector.multi_reduction <add>, %1, %cst_6 [1] : vector<1x256xf32> to vector<1xf32>
    %11 = vector.shape_cast %10 : vector<1xf32> to vector<1x1xf32>
    %cst_7 = arith.constant 2.560000e+02 : f32
    %12 = vector.broadcast %cst_7 : f32 to vector<1x1xf32>
    %13 = arith.divf %11, %12 : vector<1x1xf32>
    %14 = vector.broadcast %13 : vector<1x1xf32> to vector<1x256xf32>
    %15 = arith.subf %1, %14 : vector<1x256xf32>
    %cst_8 = arith.constant dense<0.000000e+00> : vector<1xf32>
    %16 = vector.multi_reduction <add>, %3, %cst_8 [1] : vector<1x256xf32> to vector<1xf32>
    %17 = vector.shape_cast %16 : vector<1xf32> to vector<1x1xf32>
    %cst_9 = arith.constant 2.560000e+02 : f32
    %18 = vector.broadcast %cst_9 : f32 to vector<1x1xf32>
    %19 = arith.divf %17, %18 : vector<1x1xf32>
    %20 = vector.broadcast %19 : vector<1x1xf32> to vector<1x256xf32>
    %21 = arith.subf %3, %20 : vector<1x256xf32>
    %22 = arith.mulf %21, %15 : vector<1x256xf32>
    %cst_10 = arith.constant dense<0.000000e+00> : vector<1xf32>
    %23 = vector.multi_reduction <add>, %22, %cst_10 [1] : vector<1x256xf32> to vector<1xf32>
    %24 = vector.shape_cast %23 : vector<1xf32> to vector<1x1xf32>
    %25 = arith.mulf %21, %21 : vector<1x256xf32>
    %cst_11 = arith.constant dense<0.000000e+00> : vector<1xf32>
    %26 = vector.multi_reduction <add>, %25, %cst_11 [1] : vector<1x256xf32> to vector<1xf32>
    %27 = vector.shape_cast %26 : vector<1xf32> to vector<1x1xf32>
    %28 = arith.mulf %15, %15 : vector<1x256xf32>
    %cst_12 = arith.constant dense<0.000000e+00> : vector<1xf32>
    %29 = vector.multi_reduction <add>, %28, %cst_12 [1] : vector<1x256xf32> to vector<1xf32>
    %30 = vector.shape_cast %29 : vector<1xf32> to vector<1x1xf32>
    %31 = arith.mulf %27, %30 : vector<1x1xf32>
    %32 = math.rsqrt %31 : vector<1x1xf32>
    %33 = arith.mulf %24, %32 : vector<1x1xf32>
    %34 = vector.shape_cast %1 : vector<1x256xf32> to vector<1x256xf32>
    %35 = vector.broadcast %34 : vector<1x256xf32> to vector<8x256xf32>
    %36 = vector.shape_cast %3 : vector<1x256xf32> to vector<1x256xf32>
    %37 = vector.broadcast %36 : vector<1x256xf32> to vector<8x256xf32>
    %cst_13 = arith.constant 0.000000e+00 : f32
    %38 = vector.broadcast %cst_13 : f32 to vector<8x256xf32>
    %c0_i32 = arith.constant 0 : i32
    %c8_i32 = arith.constant 8 : i32
    %39 = arith.muli %c0_i32, %c8_i32 : i32
    %40 = tpu.assume_multiple %39, 8 : i32
    %c0_14 = arith.constant 0 : index
    %41 = arith.index_cast %40 : i32 to index
    %c0_15 = arith.constant 0 : index
    %42 = vector.load %arg3[%c0_14, %41, %c0_15] : memref<1x256x2xf32, #tpu.memory_space<vmem>>, vector<1x8x2xf32>
    %43 = vector.shape_cast %42 : vector<1x8x2xf32> to vector<8x2xf32>
    %44 = vector.extract_strided_slice %43 {offsets = [0, 0], sizes = [8, 1], strides = [1, 1]} : vector<8x2xf32> to vector<8x1xf32>
    %45 = vector.extract_strided_slice %43 {offsets = [0, 1], sizes = [8, 1], strides = [1, 1]} : vector<8x2xf32> to vector<8x1xf32>
    %46 = vector.broadcast %44 : vector<8x1xf32> to vector<8x256xf32>
    %47 = arith.cmpf olt, %46, %35 : vector<8x256xf32>
    %48 = arith.extui %47 : vector<8x256xi1> to vector<8x256xi32>
    %49 = arith.sitofp %48 : vector<8x256xi32> to vector<8x256xf32>
    %50 = vector.broadcast %45 : vector<8x1xf32> to vector<8x256xf32>
    %51 = arith.cmpf olt, %50, %37 : vector<8x256xf32>
    %52 = arith.extui %51 : vector<8x256xi1> to vector<8x256xi32>
    %53 = arith.sitofp %52 : vector<8x256xi32> to vector<8x256xf32>
    %54 = arith.addf %38, %49 : vector<8x256xf32>
    %55 = arith.addf %38, %53 : vector<8x256xf32>
    %c1_i32 = arith.constant 1 : i32
    %c8_i32_16 = arith.constant 8 : i32
    %56 = arith.muli %c1_i32, %c8_i32_16 : i32
    %57 = tpu.assume_multiple %56, 8 : i32
    %c0_17 = arith.constant 0 : index
    %58 = arith.index_cast %57 : i32 to index
    %c0_18 = arith.constant 0 : index
    %59 = vector.load %arg3[%c0_17, %58, %c0_18] : memref<1x256x2xf32, #tpu.memory_space<vmem>>, vector<1x8x2xf32>
    %60 = vector.shape_cast %59 : vector<1x8x2xf32> to vector<8x2xf32>
    %61 = vector.extract_strided_slice %60 {offsets = [0, 0], sizes = [8, 1], strides = [1, 1]} : vector<8x2xf32> to vector<8x1xf32>
    %62 = vector.extract_strided_slice %60 {offsets = [0, 1], sizes = [8, 1], strides = [1, 1]} : vector<8x2xf32> to vector<8x1xf32>
    %63 = vector.broadcast %61 : vector<8x1xf32> to vector<8x256xf32>
    %64 = arith.cmpf olt, %63, %35 : vector<8x256xf32>
    %65 = arith.extui %64 : vector<8x256xi1> to vector<8x256xi32>
    %66 = arith.sitofp %65 : vector<8x256xi32> to vector<8x256xf32>
    %67 = vector.broadcast %62 : vector<8x1xf32> to vector<8x256xf32>
    %68 = arith.cmpf olt, %67, %37 : vector<8x256xf32>
    %69 = arith.extui %68 : vector<8x256xi1> to vector<8x256xi32>
    %70 = arith.sitofp %69 : vector<8x256xi32> to vector<8x256xf32>
    %71 = arith.addf %54, %66 : vector<8x256xf32>
    %72 = arith.addf %55, %70 : vector<8x256xf32>
    %c2_i32 = arith.constant 2 : i32
    %c8_i32_19 = arith.constant 8 : i32
    %73 = arith.muli %c2_i32, %c8_i32_19 : i32
    %74 = tpu.assume_multiple %73, 8 : i32
    %c0_20 = arith.constant 0 : index
    %75 = arith.index_cast %74 : i32 to index
    %c0_21 = arith.constant 0 : index
    %76 = vector.load %arg3[%c0_20, %75, %c0_21] : memref<1x256x2xf32, #tpu.memory_space<vmem>>, vector<1x8x2xf32>
    %77 = vector.shape_cast %76 : vector<1x8x2xf32> to vector<8x2xf32>
    %78 = vector.extract_strided_slice %77 {offsets = [0, 0], sizes = [8, 1], strides = [1, 1]} : vector<8x2xf32> to vector<8x1xf32>
    %79 = vector.extract_strided_slice %77 {offsets = [0, 1], sizes = [8, 1], strides = [1, 1]} : vector<8x2xf32> to vector<8x1xf32>
    %80 = vector.broadcast %78 : vector<8x1xf32> to vector<8x256xf32>
    %81 = arith.cmpf olt, %80, %35 : vector<8x256xf32>
    %82 = arith.extui %81 : vector<8x256xi1> to vector<8x256xi32>
    %83 = arith.sitofp %82 : vector<8x256xi32> to vector<8x256xf32>
    %84 = vector.broadcast %79 : vector<8x1xf32> to vector<8x256xf32>
    %85 = arith.cmpf olt, %84, %37 : vector<8x256xf32>
    %86 = arith.extui %85 : vector<8x256xi1> to vector<8x256xi32>
    %87 = arith.sitofp %86 : vector<8x256xi32> to vector<8x256xf32>
    %88 = arith.addf %71, %83 : vector<8x256xf32>
    %89 = arith.addf %72, %87 : vector<8x256xf32>
    %c3_i32 = arith.constant 3 : i32
    %c8_i32_22 = arith.constant 8 : i32
    %90 = arith.muli %c3_i32, %c8_i32_22 : i32
    %91 = tpu.assume_multiple %90, 8 : i32
    %c0_23 = arith.constant 0 : index
    %92 = arith.index_cast %91 : i32 to index
    %c0_24 = arith.constant 0 : index
    %93 = vector.load %arg3[%c0_23, %92, %c0_24] : memref<1x256x2xf32, #tpu.memory_space<vmem>>, vector<1x8x2xf32>
    %94 = vector.shape_cast %93 : vector<1x8x2xf32> to vector<8x2xf32>
    %95 = vector.extract_strided_slice %94 {offsets = [0, 0], sizes = [8, 1], strides = [1, 1]} : vector<8x2xf32> to vector<8x1xf32>
    %96 = vector.extract_strided_slice %94 {offsets = [0, 1], sizes = [8, 1], strides = [1, 1]} : vector<8x2xf32> to vector<8x1xf32>
    %97 = vector.broadcast %95 : vector<8x1xf32> to vector<8x256xf32>
    %98 = arith.cmpf olt, %97, %35 : vector<8x256xf32>
    %99 = arith.extui %98 : vector<8x256xi1> to vector<8x256xi32>
    %100 = arith.sitofp %99 : vector<8x256xi32> to vector<8x256xf32>
    %101 = vector.broadcast %96 : vector<8x1xf32> to vector<8x256xf32>
    %102 = arith.cmpf olt, %101, %37 : vector<8x256xf32>
    %103 = arith.extui %102 : vector<8x256xi1> to vector<8x256xi32>
    %104 = arith.sitofp %103 : vector<8x256xi32> to vector<8x256xf32>
    %105 = arith.addf %88, %100 : vector<8x256xf32>
    %106 = arith.addf %89, %104 : vector<8x256xf32>
    %c4_i32 = arith.constant 4 : i32
    %c8_i32_25 = arith.constant 8 : i32
    %107 = arith.muli %c4_i32, %c8_i32_25 : i32
    %108 = tpu.assume_multiple %107, 8 : i32
    %c0_26 = arith.constant 0 : index
    %109 = arith.index_cast %108 : i32 to index
    %c0_27 = arith.constant 0 : index
    %110 = vector.load %arg3[%c0_26, %109, %c0_27] : memref<1x256x2xf32, #tpu.memory_space<vmem>>, vector<1x8x2xf32>
    %111 = vector.shape_cast %110 : vector<1x8x2xf32> to vector<8x2xf32>
    %112 = vector.extract_strided_slice %111 {offsets = [0, 0], sizes = [8, 1], strides = [1, 1]} : vector<8x2xf32> to vector<8x1xf32>
    %113 = vector.extract_strided_slice %111 {offsets = [0, 1], sizes = [8, 1], strides = [1, 1]} : vector<8x2xf32> to vector<8x1xf32>
    %114 = vector.broadcast %112 : vector<8x1xf32> to vector<8x256xf32>
    %115 = arith.cmpf olt, %114, %35 : vector<8x256xf32>
    %116 = arith.extui %115 : vector<8x256xi1> to vector<8x256xi32>
    %117 = arith.sitofp %116 : vector<8x256xi32> to vector<8x256xf32>
    %118 = vector.broadcast %113 : vector<8x1xf32> to vector<8x256xf32>
    %119 = arith.cmpf olt, %118, %37 : vector<8x256xf32>
    %120 = arith.extui %119 : vector<8x256xi1> to vector<8x256xi32>
    %121 = arith.sitofp %120 : vector<8x256xi32> to vector<8x256xf32>
    %122 = arith.addf %105, %117 : vector<8x256xf32>
    %123 = arith.addf %106, %121 : vector<8x256xf32>
    %c5_i32 = arith.constant 5 : i32
    %c8_i32_28 = arith.constant 8 : i32
    %124 = arith.muli %c5_i32, %c8_i32_28 : i32
    %125 = tpu.assume_multiple %124, 8 : i32
    %c0_29 = arith.constant 0 : index
    %126 = arith.index_cast %125 : i32 to index
    %c0_30 = arith.constant 0 : index
    %127 = vector.load %arg3[%c0_29, %126, %c0_30] : memref<1x256x2xf32, #tpu.memory_space<vmem>>, vector<1x8x2xf32>
    %128 = vector.shape_cast %127 : vector<1x8x2xf32> to vector<8x2xf32>
    %129 = vector.extract_strided_slice %128 {offsets = [0, 0], sizes = [8, 1], strides = [1, 1]} : vector<8x2xf32> to vector<8x1xf32>
    %130 = vector.extract_strided_slice %128 {offsets = [0, 1], sizes = [8, 1], strides = [1, 1]} : vector<8x2xf32> to vector<8x1xf32>
    %131 = vector.broadcast %129 : vector<8x1xf32> to vector<8x256xf32>
    %132 = arith.cmpf olt, %131, %35 : vector<8x256xf32>
    %133 = arith.extui %132 : vector<8x256xi1> to vector<8x256xi32>
    %134 = arith.sitofp %133 : vector<8x256xi32> to vector<8x256xf32>
    %135 = vector.broadcast %130 : vector<8x1xf32> to vector<8x256xf32>
    %136 = arith.cmpf olt, %135, %37 : vector<8x256xf32>
    %137 = arith.extui %136 : vector<8x256xi1> to vector<8x256xi32>
    %138 = arith.sitofp %137 : vector<8x256xi32> to vector<8x256xf32>
    %139 = arith.addf %122, %134 : vector<8x256xf32>
    %140 = arith.addf %123, %138 : vector<8x256xf32>
    %c6_i32 = arith.constant 6 : i32
    %c8_i32_31 = arith.constant 8 : i32
    %141 = arith.muli %c6_i32, %c8_i32_31 : i32
    %142 = tpu.assume_multiple %141, 8 : i32
    %c0_32 = arith.constant 0 : index
    %143 = arith.index_cast %142 : i32 to index
    %c0_33 = arith.constant 0 : index
    %144 = vector.load %arg3[%c0_32, %143, %c0_33] : memref<1x256x2xf32, #tpu.memory_space<vmem>>, vector<1x8x2xf32>
    %145 = vector.shape_cast %144 : vector<1x8x2xf32> to vector<8x2xf32>
    %146 = vector.extract_strided_slice %145 {offsets = [0, 0], sizes = [8, 1], strides = [1, 1]} : vector<8x2xf32> to vector<8x1xf32>
    %147 = vector.extract_strided_slice %145 {offsets = [0, 1], sizes = [8, 1], strides = [1, 1]} : vector<8x2xf32> to vector<8x1xf32>
    %148 = vector.broadcast %146 : vector<8x1xf32> to vector<8x256xf32>
    %149 = arith.cmpf olt, %148, %35 : vector<8x256xf32>
    %150 = arith.extui %149 : vector<8x256xi1> to vector<8x256xi32>
    %151 = arith.sitofp %150 : vector<8x256xi32> to vector<8x256xf32>
    %152 = vector.broadcast %147 : vector<8x1xf32> to vector<8x256xf32>
    %153 = arith.cmpf olt, %152, %37 : vector<8x256xf32>
    %154 = arith.extui %153 : vector<8x256xi1> to vector<8x256xi32>
    %155 = arith.sitofp %154 : vector<8x256xi32> to vector<8x256xf32>
    %156 = arith.addf %139, %151 : vector<8x256xf32>
    %157 = arith.addf %140, %155 : vector<8x256xf32>
    %c7_i32 = arith.constant 7 : i32
    %c8_i32_34 = arith.constant 8 : i32
    %158 = arith.muli %c7_i32, %c8_i32_34 : i32
    %159 = tpu.assume_multiple %158, 8 : i32
    %c0_35 = arith.constant 0 : index
    %160 = arith.index_cast %159 : i32 to index
    %c0_36 = arith.constant 0 : index
    %161 = vector.load %arg3[%c0_35, %160, %c0_36] : memref<1x256x2xf32, #tpu.memory_space<vmem>>, vector<1x8x2xf32>
    %162 = vector.shape_cast %161 : vector<1x8x2xf32> to vector<8x2xf32>
    %163 = vector.extract_strided_slice %162 {offsets = [0, 0], sizes = [8, 1], strides = [1, 1]} : vector<8x2xf32> to vector<8x1xf32>
    %164 = vector.extract_strided_slice %162 {offsets = [0, 1], sizes = [8, 1], strides = [1, 1]} : vector<8x2xf32> to vector<8x1xf32>
    %165 = vector.broadcast %163 : vector<8x1xf32> to vector<8x256xf32>
    %166 = arith.cmpf olt, %165, %35 : vector<8x256xf32>
    %167 = arith.extui %166 : vector<8x256xi1> to vector<8x256xi32>
    %168 = arith.sitofp %167 : vector<8x256xi32> to vector<8x256xf32>
    %169 = vector.broadcast %164 : vector<8x1xf32> to vector<8x256xf32>
    %170 = arith.cmpf olt, %169, %37 : vector<8x256xf32>
    %171 = arith.extui %170 : vector<8x256xi1> to vector<8x256xi32>
    %172 = arith.sitofp %171 : vector<8x256xi32> to vector<8x256xf32>
    %173 = arith.addf %156, %168 : vector<8x256xf32>
    %174 = arith.addf %157, %172 : vector<8x256xf32>
    %c8_i32_37 = arith.constant 8 : i32
    %c8_i32_38 = arith.constant 8 : i32
    %175 = arith.muli %c8_i32_37, %c8_i32_38 : i32
    %176 = tpu.assume_multiple %175, 8 : i32
    %c0_39 = arith.constant 0 : index
    %177 = arith.index_cast %176 : i32 to index
    %c0_40 = arith.constant 0 : index
    %178 = vector.load %arg3[%c0_39, %177, %c0_40] : memref<1x256x2xf32, #tpu.memory_space<vmem>>, vector<1x8x2xf32>
    %179 = vector.shape_cast %178 : vector<1x8x2xf32> to vector<8x2xf32>
    %180 = vector.extract_strided_slice %179 {offsets = [0, 0], sizes = [8, 1], strides = [1, 1]} : vector<8x2xf32> to vector<8x1xf32>
    %181 = vector.extract_strided_slice %179 {offsets = [0, 1], sizes = [8, 1], strides = [1, 1]} : vector<8x2xf32> to vector<8x1xf32>
    %182 = vector.broadcast %180 : vector<8x1xf32> to vector<8x256xf32>
    %183 = arith.cmpf olt, %182, %35 : vector<8x256xf32>
    %184 = arith.extui %183 : vector<8x256xi1> to vector<8x256xi32>
    %185 = arith.sitofp %184 : vector<8x256xi32> to vector<8x256xf32>
    %186 = vector.broadcast %181 : vector<8x1xf32> to vector<8x256xf32>
    %187 = arith.cmpf olt, %186, %37 : vector<8x256xf32>
    %188 = arith.extui %187 : vector<8x256xi1> to vector<8x256xi32>
    %189 = arith.sitofp %188 : vector<8x256xi32> to vector<8x256xf32>
    %190 = arith.addf %173, %185 : vector<8x256xf32>
    %191 = arith.addf %174, %189 : vector<8x256xf32>
    %c9_i32 = arith.constant 9 : i32
    %c8_i32_41 = arith.constant 8 : i32
    %192 = arith.muli %c9_i32, %c8_i32_41 : i32
    %193 = tpu.assume_multiple %192, 8 : i32
    %c0_42 = arith.constant 0 : index
    %194 = arith.index_cast %193 : i32 to index
    %c0_43 = arith.constant 0 : index
    %195 = vector.load %arg3[%c0_42, %194, %c0_43] : memref<1x256x2xf32, #tpu.memory_space<vmem>>, vector<1x8x2xf32>
    %196 = vector.shape_cast %195 : vector<1x8x2xf32> to vector<8x2xf32>
    %197 = vector.extract_strided_slice %196 {offsets = [0, 0], sizes = [8, 1], strides = [1, 1]} : vector<8x2xf32> to vector<8x1xf32>
    %198 = vector.extract_strided_slice %196 {offsets = [0, 1], sizes = [8, 1], strides = [1, 1]} : vector<8x2xf32> to vector<8x1xf32>
    %199 = vector.broadcast %197 : vector<8x1xf32> to vector<8x256xf32>
    %200 = arith.cmpf olt, %199, %35 : vector<8x256xf32>
    %201 = arith.extui %200 : vector<8x256xi1> to vector<8x256xi32>
    %202 = arith.sitofp %201 : vector<8x256xi32> to vector<8x256xf32>
    %203 = vector.broadcast %198 : vector<8x1xf32> to vector<8x256xf32>
    %204 = arith.cmpf olt, %203, %37 : vector<8x256xf32>
    %205 = arith.extui %204 : vector<8x256xi1> to vector<8x256xi32>
    %206 = arith.sitofp %205 : vector<8x256xi32> to vector<8x256xf32>
    %207 = arith.addf %190, %202 : vector<8x256xf32>
    %208 = arith.addf %191, %206 : vector<8x256xf32>
    %c10_i32 = arith.constant 10 : i32
    %c8_i32_44 = arith.constant 8 : i32
    %209 = arith.muli %c10_i32, %c8_i32_44 : i32
    %210 = tpu.assume_multiple %209, 8 : i32
    %c0_45 = arith.constant 0 : index
    %211 = arith.index_cast %210 : i32 to index
    %c0_46 = arith.constant 0 : index
    %212 = vector.load %arg3[%c0_45, %211, %c0_46] : memref<1x256x2xf32, #tpu.memory_space<vmem>>, vector<1x8x2xf32>
    %213 = vector.shape_cast %212 : vector<1x8x2xf32> to vector<8x2xf32>
    %214 = vector.extract_strided_slice %213 {offsets = [0, 0], sizes = [8, 1], strides = [1, 1]} : vector<8x2xf32> to vector<8x1xf32>
    %215 = vector.extract_strided_slice %213 {offsets = [0, 1], sizes = [8, 1], strides = [1, 1]} : vector<8x2xf32> to vector<8x1xf32>
    %216 = vector.broadcast %214 : vector<8x1xf32> to vector<8x256xf32>
    %217 = arith.cmpf olt, %216, %35 : vector<8x256xf32>
    %218 = arith.extui %217 : vector<8x256xi1> to vector<8x256xi32>
    %219 = arith.sitofp %218 : vector<8x256xi32> to vector<8x256xf32>
    %220 = vector.broadcast %215 : vector<8x1xf32> to vector<8x256xf32>
    %221 = arith.cmpf olt, %220, %37 : vector<8x256xf32>
    %222 = arith.extui %221 : vector<8x256xi1> to vector<8x256xi32>
    %223 = arith.sitofp %222 : vector<8x256xi32> to vector<8x256xf32>
    %224 = arith.addf %207, %219 : vector<8x256xf32>
    %225 = arith.addf %208, %223 : vector<8x256xf32>
    %c11_i32 = arith.constant 11 : i32
    %c8_i32_47 = arith.constant 8 : i32
    %226 = arith.muli %c11_i32, %c8_i32_47 : i32
    %227 = tpu.assume_multiple %226, 8 : i32
    %c0_48 = arith.constant 0 : index
    %228 = arith.index_cast %227 : i32 to index
    %c0_49 = arith.constant 0 : index
    %229 = vector.load %arg3[%c0_48, %228, %c0_49] : memref<1x256x2xf32, #tpu.memory_space<vmem>>, vector<1x8x2xf32>
    %230 = vector.shape_cast %229 : vector<1x8x2xf32> to vector<8x2xf32>
    %231 = vector.extract_strided_slice %230 {offsets = [0, 0], sizes = [8, 1], strides = [1, 1]} : vector<8x2xf32> to vector<8x1xf32>
    %232 = vector.extract_strided_slice %230 {offsets = [0, 1], sizes = [8, 1], strides = [1, 1]} : vector<8x2xf32> to vector<8x1xf32>
    %233 = vector.broadcast %231 : vector<8x1xf32> to vector<8x256xf32>
    %234 = arith.cmpf olt, %233, %35 : vector<8x256xf32>
    %235 = arith.extui %234 : vector<8x256xi1> to vector<8x256xi32>
    %236 = arith.sitofp %235 : vector<8x256xi32> to vector<8x256xf32>
    %237 = vector.broadcast %232 : vector<8x1xf32> to vector<8x256xf32>
    %238 = arith.cmpf olt, %237, %37 : vector<8x256xf32>
    %239 = arith.extui %238 : vector<8x256xi1> to vector<8x256xi32>
    %240 = arith.sitofp %239 : vector<8x256xi32> to vector<8x256xf32>
    %241 = arith.addf %224, %236 : vector<8x256xf32>
    %242 = arith.addf %225, %240 : vector<8x256xf32>
    %c12_i32 = arith.constant 12 : i32
    %c8_i32_50 = arith.constant 8 : i32
    %243 = arith.muli %c12_i32, %c8_i32_50 : i32
    %244 = tpu.assume_multiple %243, 8 : i32
    %c0_51 = arith.constant 0 : index
    %245 = arith.index_cast %244 : i32 to index
    %c0_52 = arith.constant 0 : index
    %246 = vector.load %arg3[%c0_51, %245, %c0_52] : memref<1x256x2xf32, #tpu.memory_space<vmem>>, vector<1x8x2xf32>
    %247 = vector.shape_cast %246 : vector<1x8x2xf32> to vector<8x2xf32>
    %248 = vector.extract_strided_slice %247 {offsets = [0, 0], sizes = [8, 1], strides = [1, 1]} : vector<8x2xf32> to vector<8x1xf32>
    %249 = vector.extract_strided_slice %247 {offsets = [0, 1], sizes = [8, 1], strides = [1, 1]} : vector<8x2xf32> to vector<8x1xf32>
    %250 = vector.broadcast %248 : vector<8x1xf32> to vector<8x256xf32>
    %251 = arith.cmpf olt, %250, %35 : vector<8x256xf32>
    %252 = arith.extui %251 : vector<8x256xi1> to vector<8x256xi32>
    %253 = arith.sitofp %252 : vector<8x256xi32> to vector<8x256xf32>
    %254 = vector.broadcast %249 : vector<8x1xf32> to vector<8x256xf32>
    %255 = arith.cmpf olt, %254, %37 : vector<8x256xf32>
    %256 = arith.extui %255 : vector<8x256xi1> to vector<8x256xi32>
    %257 = arith.sitofp %256 : vector<8x256xi32> to vector<8x256xf32>
    %258 = arith.addf %241, %253 : vector<8x256xf32>
    %259 = arith.addf %242, %257 : vector<8x256xf32>
    %c13_i32 = arith.constant 13 : i32
    %c8_i32_53 = arith.constant 8 : i32
    %260 = arith.muli %c13_i32, %c8_i32_53 : i32
    %261 = tpu.assume_multiple %260, 8 : i32
    %c0_54 = arith.constant 0 : index
    %262 = arith.index_cast %261 : i32 to index
    %c0_55 = arith.constant 0 : index
    %263 = vector.load %arg3[%c0_54, %262, %c0_55] : memref<1x256x2xf32, #tpu.memory_space<vmem>>, vector<1x8x2xf32>
    %264 = vector.shape_cast %263 : vector<1x8x2xf32> to vector<8x2xf32>
    %265 = vector.extract_strided_slice %264 {offsets = [0, 0], sizes = [8, 1], strides = [1, 1]} : vector<8x2xf32> to vector<8x1xf32>
    %266 = vector.extract_strided_slice %264 {offsets = [0, 1], sizes = [8, 1], strides = [1, 1]} : vector<8x2xf32> to vector<8x1xf32>
    %267 = vector.broadcast %265 : vector<8x1xf32> to vector<8x256xf32>
    %268 = arith.cmpf olt, %267, %35 : vector<8x256xf32>
    %269 = arith.extui %268 : vector<8x256xi1> to vector<8x256xi32>
    %270 = arith.sitofp %269 : vector<8x256xi32> to vector<8x256xf32>
    %271 = vector.broadcast %266 : vector<8x1xf32> to vector<8x256xf32>
    %272 = arith.cmpf olt, %271, %37 : vector<8x256xf32>
    %273 = arith.extui %272 : vector<8x256xi1> to vector<8x256xi32>
    %274 = arith.sitofp %273 : vector<8x256xi32> to vector<8x256xf32>
    %275 = arith.addf %258, %270 : vector<8x256xf32>
    %276 = arith.addf %259, %274 : vector<8x256xf32>
    %c14_i32 = arith.constant 14 : i32
    %c8_i32_56 = arith.constant 8 : i32
    %277 = arith.muli %c14_i32, %c8_i32_56 : i32
    %278 = tpu.assume_multiple %277, 8 : i32
    %c0_57 = arith.constant 0 : index
    %279 = arith.index_cast %278 : i32 to index
    %c0_58 = arith.constant 0 : index
    %280 = vector.load %arg3[%c0_57, %279, %c0_58] : memref<1x256x2xf32, #tpu.memory_space<vmem>>, vector<1x8x2xf32>
    %281 = vector.shape_cast %280 : vector<1x8x2xf32> to vector<8x2xf32>
    %282 = vector.extract_strided_slice %281 {offsets = [0, 0], sizes = [8, 1], strides = [1, 1]} : vector<8x2xf32> to vector<8x1xf32>
    %283 = vector.extract_strided_slice %281 {offsets = [0, 1], sizes = [8, 1], strides = [1, 1]} : vector<8x2xf32> to vector<8x1xf32>
    %284 = vector.broadcast %282 : vector<8x1xf32> to vector<8x256xf32>
    %285 = arith.cmpf olt, %284, %35 : vector<8x256xf32>
    %286 = arith.extui %285 : vector<8x256xi1> to vector<8x256xi32>
    %287 = arith.sitofp %286 : vector<8x256xi32> to vector<8x256xf32>
    %288 = vector.broadcast %283 : vector<8x1xf32> to vector<8x256xf32>
    %289 = arith.cmpf olt, %288, %37 : vector<8x256xf32>
    %290 = arith.extui %289 : vector<8x256xi1> to vector<8x256xi32>
    %291 = arith.sitofp %290 : vector<8x256xi32> to vector<8x256xf32>
    %292 = arith.addf %275, %287 : vector<8x256xf32>
    %293 = arith.addf %276, %291 : vector<8x256xf32>
    %c15_i32 = arith.constant 15 : i32
    %c8_i32_59 = arith.constant 8 : i32
    %294 = arith.muli %c15_i32, %c8_i32_59 : i32
    %295 = tpu.assume_multiple %294, 8 : i32
    %c0_60 = arith.constant 0 : index
    %296 = arith.index_cast %295 : i32 to index
    %c0_61 = arith.constant 0 : index
    %297 = vector.load %arg3[%c0_60, %296, %c0_61] : memref<1x256x2xf32, #tpu.memory_space<vmem>>, vector<1x8x2xf32>
    %298 = vector.shape_cast %297 : vector<1x8x2xf32> to vector<8x2xf32>
    %299 = vector.extract_strided_slice %298 {offsets = [0, 0], sizes = [8, 1], strides = [1, 1]} : vector<8x2xf32> to vector<8x1xf32>
    %300 = vector.extract_strided_slice %298 {offsets = [0, 1], sizes = [8, 1], strides = [1, 1]} : vector<8x2xf32> to vector<8x1xf32>
    %301 = vector.broadcast %299 : vector<8x1xf32> to vector<8x256xf32>
    %302 = arith.cmpf olt, %301, %35 : vector<8x256xf32>
    %303 = arith.extui %302 : vector<8x256xi1> to vector<8x256xi32>
    %304 = arith.sitofp %303 : vector<8x256xi32> to vector<8x256xf32>
    %305 = vector.broadcast %300 : vector<8x1xf32> to vector<8x256xf32>
    %306 = arith.cmpf olt, %305, %37 : vector<8x256xf32>
    %307 = arith.extui %306 : vector<8x256xi1> to vector<8x256xi32>
    %308 = arith.sitofp %307 : vector<8x256xi32> to vector<8x256xf32>
    %309 = arith.addf %292, %304 : vector<8x256xf32>
    %310 = arith.addf %293, %308 : vector<8x256xf32>
    %c16_i32 = arith.constant 16 : i32
    %c8_i32_62 = arith.constant 8 : i32
    %311 = arith.muli %c16_i32, %c8_i32_62 : i32
    %312 = tpu.assume_multiple %311, 8 : i32
    %c0_63 = arith.constant 0 : index
    %313 = arith.index_cast %312 : i32 to index
    %c0_64 = arith.constant 0 : index
    %314 = vector.load %arg3[%c0_63, %313, %c0_64] : memref<1x256x2xf32, #tpu.memory_space<vmem>>, vector<1x8x2xf32>
    %315 = vector.shape_cast %314 : vector<1x8x2xf32> to vector<8x2xf32>
    %316 = vector.extract_strided_slice %315 {offsets = [0, 0], sizes = [8, 1], strides = [1, 1]} : vector<8x2xf32> to vector<8x1xf32>
    %317 = vector.extract_strided_slice %315 {offsets = [0, 1], sizes = [8, 1], strides = [1, 1]} : vector<8x2xf32> to vector<8x1xf32>
    %318 = vector.broadcast %316 : vector<8x1xf32> to vector<8x256xf32>
    %319 = arith.cmpf olt, %318, %35 : vector<8x256xf32>
    %320 = arith.extui %319 : vector<8x256xi1> to vector<8x256xi32>
    %321 = arith.sitofp %320 : vector<8x256xi32> to vector<8x256xf32>
    %322 = vector.broadcast %317 : vector<8x1xf32> to vector<8x256xf32>
    %323 = arith.cmpf olt, %322, %37 : vector<8x256xf32>
    %324 = arith.extui %323 : vector<8x256xi1> to vector<8x256xi32>
    %325 = arith.sitofp %324 : vector<8x256xi32> to vector<8x256xf32>
    %326 = arith.addf %309, %321 : vector<8x256xf32>
    %327 = arith.addf %310, %325 : vector<8x256xf32>
    %c17_i32 = arith.constant 17 : i32
    %c8_i32_65 = arith.constant 8 : i32
    %328 = arith.muli %c17_i32, %c8_i32_65 : i32
    %329 = tpu.assume_multiple %328, 8 : i32
    %c0_66 = arith.constant 0 : index
    %330 = arith.index_cast %329 : i32 to index
    %c0_67 = arith.constant 0 : index
    %331 = vector.load %arg3[%c0_66, %330, %c0_67] : memref<1x256x2xf32, #tpu.memory_space<vmem>>, vector<1x8x2xf32>
    %332 = vector.shape_cast %331 : vector<1x8x2xf32> to vector<8x2xf32>
    %333 = vector.extract_strided_slice %332 {offsets = [0, 0], sizes = [8, 1], strides = [1, 1]} : vector<8x2xf32> to vector<8x1xf32>
    %334 = vector.extract_strided_slice %332 {offsets = [0, 1], sizes = [8, 1], strides = [1, 1]} : vector<8x2xf32> to vector<8x1xf32>
    %335 = vector.broadcast %333 : vector<8x1xf32> to vector<8x256xf32>
    %336 = arith.cmpf olt, %335, %35 : vector<8x256xf32>
    %337 = arith.extui %336 : vector<8x256xi1> to vector<8x256xi32>
    %338 = arith.sitofp %337 : vector<8x256xi32> to vector<8x256xf32>
    %339 = vector.broadcast %334 : vector<8x1xf32> to vector<8x256xf32>
    %340 = arith.cmpf olt, %339, %37 : vector<8x256xf32>
    %341 = arith.extui %340 : vector<8x256xi1> to vector<8x256xi32>
    %342 = arith.sitofp %341 : vector<8x256xi32> to vector<8x256xf32>
    %343 = arith.addf %326, %338 : vector<8x256xf32>
    %344 = arith.addf %327, %342 : vector<8x256xf32>
    %c18_i32 = arith.constant 18 : i32
    %c8_i32_68 = arith.constant 8 : i32
    %345 = arith.muli %c18_i32, %c8_i32_68 : i32
    %346 = tpu.assume_multiple %345, 8 : i32
    %c0_69 = arith.constant 0 : index
    %347 = arith.index_cast %346 : i32 to index
    %c0_70 = arith.constant 0 : index
    %348 = vector.load %arg3[%c0_69, %347, %c0_70] : memref<1x256x2xf32, #tpu.memory_space<vmem>>, vector<1x8x2xf32>
    %349 = vector.shape_cast %348 : vector<1x8x2xf32> to vector<8x2xf32>
    %350 = vector.extract_strided_slice %349 {offsets = [0, 0], sizes = [8, 1], strides = [1, 1]} : vector<8x2xf32> to vector<8x1xf32>
    %351 = vector.extract_strided_slice %349 {offsets = [0, 1], sizes = [8, 1], strides = [1, 1]} : vector<8x2xf32> to vector<8x1xf32>
    %352 = vector.broadcast %350 : vector<8x1xf32> to vector<8x256xf32>
    %353 = arith.cmpf olt, %352, %35 : vector<8x256xf32>
    %354 = arith.extui %353 : vector<8x256xi1> to vector<8x256xi32>
    %355 = arith.sitofp %354 : vector<8x256xi32> to vector<8x256xf32>
    %356 = vector.broadcast %351 : vector<8x1xf32> to vector<8x256xf32>
    %357 = arith.cmpf olt, %356, %37 : vector<8x256xf32>
    %358 = arith.extui %357 : vector<8x256xi1> to vector<8x256xi32>
    %359 = arith.sitofp %358 : vector<8x256xi32> to vector<8x256xf32>
    %360 = arith.addf %343, %355 : vector<8x256xf32>
    %361 = arith.addf %344, %359 : vector<8x256xf32>
    %c19_i32 = arith.constant 19 : i32
    %c8_i32_71 = arith.constant 8 : i32
    %362 = arith.muli %c19_i32, %c8_i32_71 : i32
    %363 = tpu.assume_multiple %362, 8 : i32
    %c0_72 = arith.constant 0 : index
    %364 = arith.index_cast %363 : i32 to index
    %c0_73 = arith.constant 0 : index
    %365 = vector.load %arg3[%c0_72, %364, %c0_73] : memref<1x256x2xf32, #tpu.memory_space<vmem>>, vector<1x8x2xf32>
    %366 = vector.shape_cast %365 : vector<1x8x2xf32> to vector<8x2xf32>
    %367 = vector.extract_strided_slice %366 {offsets = [0, 0], sizes = [8, 1], strides = [1, 1]} : vector<8x2xf32> to vector<8x1xf32>
    %368 = vector.extract_strided_slice %366 {offsets = [0, 1], sizes = [8, 1], strides = [1, 1]} : vector<8x2xf32> to vector<8x1xf32>
    %369 = vector.broadcast %367 : vector<8x1xf32> to vector<8x256xf32>
    %370 = arith.cmpf olt, %369, %35 : vector<8x256xf32>
    %371 = arith.extui %370 : vector<8x256xi1> to vector<8x256xi32>
    %372 = arith.sitofp %371 : vector<8x256xi32> to vector<8x256xf32>
    %373 = vector.broadcast %368 : vector<8x1xf32> to vector<8x256xf32>
    %374 = arith.cmpf olt, %373, %37 : vector<8x256xf32>
    %375 = arith.extui %374 : vector<8x256xi1> to vector<8x256xi32>
    %376 = arith.sitofp %375 : vector<8x256xi32> to vector<8x256xf32>
    %377 = arith.addf %360, %372 : vector<8x256xf32>
    %378 = arith.addf %361, %376 : vector<8x256xf32>
    %c20_i32 = arith.constant 20 : i32
    %c8_i32_74 = arith.constant 8 : i32
    %379 = arith.muli %c20_i32, %c8_i32_74 : i32
    %380 = tpu.assume_multiple %379, 8 : i32
    %c0_75 = arith.constant 0 : index
    %381 = arith.index_cast %380 : i32 to index
    %c0_76 = arith.constant 0 : index
    %382 = vector.load %arg3[%c0_75, %381, %c0_76] : memref<1x256x2xf32, #tpu.memory_space<vmem>>, vector<1x8x2xf32>
    %383 = vector.shape_cast %382 : vector<1x8x2xf32> to vector<8x2xf32>
    %384 = vector.extract_strided_slice %383 {offsets = [0, 0], sizes = [8, 1], strides = [1, 1]} : vector<8x2xf32> to vector<8x1xf32>
    %385 = vector.extract_strided_slice %383 {offsets = [0, 1], sizes = [8, 1], strides = [1, 1]} : vector<8x2xf32> to vector<8x1xf32>
    %386 = vector.broadcast %384 : vector<8x1xf32> to vector<8x256xf32>
    %387 = arith.cmpf olt, %386, %35 : vector<8x256xf32>
    %388 = arith.extui %387 : vector<8x256xi1> to vector<8x256xi32>
    %389 = arith.sitofp %388 : vector<8x256xi32> to vector<8x256xf32>
    %390 = vector.broadcast %385 : vector<8x1xf32> to vector<8x256xf32>
    %391 = arith.cmpf olt, %390, %37 : vector<8x256xf32>
    %392 = arith.extui %391 : vector<8x256xi1> to vector<8x256xi32>
    %393 = arith.sitofp %392 : vector<8x256xi32> to vector<8x256xf32>
    %394 = arith.addf %377, %389 : vector<8x256xf32>
    %395 = arith.addf %378, %393 : vector<8x256xf32>
    %c21_i32 = arith.constant 21 : i32
    %c8_i32_77 = arith.constant 8 : i32
    %396 = arith.muli %c21_i32, %c8_i32_77 : i32
    %397 = tpu.assume_multiple %396, 8 : i32
    %c0_78 = arith.constant 0 : index
    %398 = arith.index_cast %397 : i32 to index
    %c0_79 = arith.constant 0 : index
    %399 = vector.load %arg3[%c0_78, %398, %c0_79] : memref<1x256x2xf32, #tpu.memory_space<vmem>>, vector<1x8x2xf32>
    %400 = vector.shape_cast %399 : vector<1x8x2xf32> to vector<8x2xf32>
    %401 = vector.extract_strided_slice %400 {offsets = [0, 0], sizes = [8, 1], strides = [1, 1]} : vector<8x2xf32> to vector<8x1xf32>
    %402 = vector.extract_strided_slice %400 {offsets = [0, 1], sizes = [8, 1], strides = [1, 1]} : vector<8x2xf32> to vector<8x1xf32>
    %403 = vector.broadcast %401 : vector<8x1xf32> to vector<8x256xf32>
    %404 = arith.cmpf olt, %403, %35 : vector<8x256xf32>
    %405 = arith.extui %404 : vector<8x256xi1> to vector<8x256xi32>
    %406 = arith.sitofp %405 : vector<8x256xi32> to vector<8x256xf32>
    %407 = vector.broadcast %402 : vector<8x1xf32> to vector<8x256xf32>
    %408 = arith.cmpf olt, %407, %37 : vector<8x256xf32>
    %409 = arith.extui %408 : vector<8x256xi1> to vector<8x256xi32>
    %410 = arith.sitofp %409 : vector<8x256xi32> to vector<8x256xf32>
    %411 = arith.addf %394, %406 : vector<8x256xf32>
    %412 = arith.addf %395, %410 : vector<8x256xf32>
    %c22_i32 = arith.constant 22 : i32
    %c8_i32_80 = arith.constant 8 : i32
    %413 = arith.muli %c22_i32, %c8_i32_80 : i32
    %414 = tpu.assume_multiple %413, 8 : i32
    %c0_81 = arith.constant 0 : index
    %415 = arith.index_cast %414 : i32 to index
    %c0_82 = arith.constant 0 : index
    %416 = vector.load %arg3[%c0_81, %415, %c0_82] : memref<1x256x2xf32, #tpu.memory_space<vmem>>, vector<1x8x2xf32>
    %417 = vector.shape_cast %416 : vector<1x8x2xf32> to vector<8x2xf32>
    %418 = vector.extract_strided_slice %417 {offsets = [0, 0], sizes = [8, 1], strides = [1, 1]} : vector<8x2xf32> to vector<8x1xf32>
    %419 = vector.extract_strided_slice %417 {offsets = [0, 1], sizes = [8, 1], strides = [1, 1]} : vector<8x2xf32> to vector<8x1xf32>
    %420 = vector.broadcast %418 : vector<8x1xf32> to vector<8x256xf32>
    %421 = arith.cmpf olt, %420, %35 : vector<8x256xf32>
    %422 = arith.extui %421 : vector<8x256xi1> to vector<8x256xi32>
    %423 = arith.sitofp %422 : vector<8x256xi32> to vector<8x256xf32>
    %424 = vector.broadcast %419 : vector<8x1xf32> to vector<8x256xf32>
    %425 = arith.cmpf olt, %424, %37 : vector<8x256xf32>
    %426 = arith.extui %425 : vector<8x256xi1> to vector<8x256xi32>
    %427 = arith.sitofp %426 : vector<8x256xi32> to vector<8x256xf32>
    %428 = arith.addf %411, %423 : vector<8x256xf32>
    %429 = arith.addf %412, %427 : vector<8x256xf32>
    %c23_i32 = arith.constant 23 : i32
    %c8_i32_83 = arith.constant 8 : i32
    %430 = arith.muli %c23_i32, %c8_i32_83 : i32
    %431 = tpu.assume_multiple %430, 8 : i32
    %c0_84 = arith.constant 0 : index
    %432 = arith.index_cast %431 : i32 to index
    %c0_85 = arith.constant 0 : index
    %433 = vector.load %arg3[%c0_84, %432, %c0_85] : memref<1x256x2xf32, #tpu.memory_space<vmem>>, vector<1x8x2xf32>
    %434 = vector.shape_cast %433 : vector<1x8x2xf32> to vector<8x2xf32>
    %435 = vector.extract_strided_slice %434 {offsets = [0, 0], sizes = [8, 1], strides = [1, 1]} : vector<8x2xf32> to vector<8x1xf32>
    %436 = vector.extract_strided_slice %434 {offsets = [0, 1], sizes = [8, 1], strides = [1, 1]} : vector<8x2xf32> to vector<8x1xf32>
    %437 = vector.broadcast %435 : vector<8x1xf32> to vector<8x256xf32>
    %438 = arith.cmpf olt, %437, %35 : vector<8x256xf32>
    %439 = arith.extui %438 : vector<8x256xi1> to vector<8x256xi32>
    %440 = arith.sitofp %439 : vector<8x256xi32> to vector<8x256xf32>
    %441 = vector.broadcast %436 : vector<8x1xf32> to vector<8x256xf32>
    %442 = arith.cmpf olt, %441, %37 : vector<8x256xf32>
    %443 = arith.extui %442 : vector<8x256xi1> to vector<8x256xi32>
    %444 = arith.sitofp %443 : vector<8x256xi32> to vector<8x256xf32>
    %445 = arith.addf %428, %440 : vector<8x256xf32>
    %446 = arith.addf %429, %444 : vector<8x256xf32>
    %c24_i32 = arith.constant 24 : i32
    %c8_i32_86 = arith.constant 8 : i32
    %447 = arith.muli %c24_i32, %c8_i32_86 : i32
    %448 = tpu.assume_multiple %447, 8 : i32
    %c0_87 = arith.constant 0 : index
    %449 = arith.index_cast %448 : i32 to index
    %c0_88 = arith.constant 0 : index
    %450 = vector.load %arg3[%c0_87, %449, %c0_88] : memref<1x256x2xf32, #tpu.memory_space<vmem>>, vector<1x8x2xf32>
    %451 = vector.shape_cast %450 : vector<1x8x2xf32> to vector<8x2xf32>
    %452 = vector.extract_strided_slice %451 {offsets = [0, 0], sizes = [8, 1], strides = [1, 1]} : vector<8x2xf32> to vector<8x1xf32>
    %453 = vector.extract_strided_slice %451 {offsets = [0, 1], sizes = [8, 1], strides = [1, 1]} : vector<8x2xf32> to vector<8x1xf32>
    %454 = vector.broadcast %452 : vector<8x1xf32> to vector<8x256xf32>
    %455 = arith.cmpf olt, %454, %35 : vector<8x256xf32>
    %456 = arith.extui %455 : vector<8x256xi1> to vector<8x256xi32>
    %457 = arith.sitofp %456 : vector<8x256xi32> to vector<8x256xf32>
    %458 = vector.broadcast %453 : vector<8x1xf32> to vector<8x256xf32>
    %459 = arith.cmpf olt, %458, %37 : vector<8x256xf32>
    %460 = arith.extui %459 : vector<8x256xi1> to vector<8x256xi32>
    %461 = arith.sitofp %460 : vector<8x256xi32> to vector<8x256xf32>
    %462 = arith.addf %445, %457 : vector<8x256xf32>
    %463 = arith.addf %446, %461 : vector<8x256xf32>
    %c25_i32 = arith.constant 25 : i32
    %c8_i32_89 = arith.constant 8 : i32
    %464 = arith.muli %c25_i32, %c8_i32_89 : i32
    %465 = tpu.assume_multiple %464, 8 : i32
    %c0_90 = arith.constant 0 : index
    %466 = arith.index_cast %465 : i32 to index
    %c0_91 = arith.constant 0 : index
    %467 = vector.load %arg3[%c0_90, %466, %c0_91] : memref<1x256x2xf32, #tpu.memory_space<vmem>>, vector<1x8x2xf32>
    %468 = vector.shape_cast %467 : vector<1x8x2xf32> to vector<8x2xf32>
    %469 = vector.extract_strided_slice %468 {offsets = [0, 0], sizes = [8, 1], strides = [1, 1]} : vector<8x2xf32> to vector<8x1xf32>
    %470 = vector.extract_strided_slice %468 {offsets = [0, 1], sizes = [8, 1], strides = [1, 1]} : vector<8x2xf32> to vector<8x1xf32>
    %471 = vector.broadcast %469 : vector<8x1xf32> to vector<8x256xf32>
    %472 = arith.cmpf olt, %471, %35 : vector<8x256xf32>
    %473 = arith.extui %472 : vector<8x256xi1> to vector<8x256xi32>
    %474 = arith.sitofp %473 : vector<8x256xi32> to vector<8x256xf32>
    %475 = vector.broadcast %470 : vector<8x1xf32> to vector<8x256xf32>
    %476 = arith.cmpf olt, %475, %37 : vector<8x256xf32>
    %477 = arith.extui %476 : vector<8x256xi1> to vector<8x256xi32>
    %478 = arith.sitofp %477 : vector<8x256xi32> to vector<8x256xf32>
    %479 = arith.addf %462, %474 : vector<8x256xf32>
    %480 = arith.addf %463, %478 : vector<8x256xf32>
    %c26_i32 = arith.constant 26 : i32
    %c8_i32_92 = arith.constant 8 : i32
    %481 = arith.muli %c26_i32, %c8_i32_92 : i32
    %482 = tpu.assume_multiple %481, 8 : i32
    %c0_93 = arith.constant 0 : index
    %483 = arith.index_cast %482 : i32 to index
    %c0_94 = arith.constant 0 : index
    %484 = vector.load %arg3[%c0_93, %483, %c0_94] : memref<1x256x2xf32, #tpu.memory_space<vmem>>, vector<1x8x2xf32>
    %485 = vector.shape_cast %484 : vector<1x8x2xf32> to vector<8x2xf32>
    %486 = vector.extract_strided_slice %485 {offsets = [0, 0], sizes = [8, 1], strides = [1, 1]} : vector<8x2xf32> to vector<8x1xf32>
    %487 = vector.extract_strided_slice %485 {offsets = [0, 1], sizes = [8, 1], strides = [1, 1]} : vector<8x2xf32> to vector<8x1xf32>
    %488 = vector.broadcast %486 : vector<8x1xf32> to vector<8x256xf32>
    %489 = arith.cmpf olt, %488, %35 : vector<8x256xf32>
    %490 = arith.extui %489 : vector<8x256xi1> to vector<8x256xi32>
    %491 = arith.sitofp %490 : vector<8x256xi32> to vector<8x256xf32>
    %492 = vector.broadcast %487 : vector<8x1xf32> to vector<8x256xf32>
    %493 = arith.cmpf olt, %492, %37 : vector<8x256xf32>
    %494 = arith.extui %493 : vector<8x256xi1> to vector<8x256xi32>
    %495 = arith.sitofp %494 : vector<8x256xi32> to vector<8x256xf32>
    %496 = arith.addf %479, %491 : vector<8x256xf32>
    %497 = arith.addf %480, %495 : vector<8x256xf32>
    %c27_i32 = arith.constant 27 : i32
    %c8_i32_95 = arith.constant 8 : i32
    %498 = arith.muli %c27_i32, %c8_i32_95 : i32
    %499 = tpu.assume_multiple %498, 8 : i32
    %c0_96 = arith.constant 0 : index
    %500 = arith.index_cast %499 : i32 to index
    %c0_97 = arith.constant 0 : index
    %501 = vector.load %arg3[%c0_96, %500, %c0_97] : memref<1x256x2xf32, #tpu.memory_space<vmem>>, vector<1x8x2xf32>
    %502 = vector.shape_cast %501 : vector<1x8x2xf32> to vector<8x2xf32>
    %503 = vector.extract_strided_slice %502 {offsets = [0, 0], sizes = [8, 1], strides = [1, 1]} : vector<8x2xf32> to vector<8x1xf32>
    %504 = vector.extract_strided_slice %502 {offsets = [0, 1], sizes = [8, 1], strides = [1, 1]} : vector<8x2xf32> to vector<8x1xf32>
    %505 = vector.broadcast %503 : vector<8x1xf32> to vector<8x256xf32>
    %506 = arith.cmpf olt, %505, %35 : vector<8x256xf32>
    %507 = arith.extui %506 : vector<8x256xi1> to vector<8x256xi32>
    %508 = arith.sitofp %507 : vector<8x256xi32> to vector<8x256xf32>
    %509 = vector.broadcast %504 : vector<8x1xf32> to vector<8x256xf32>
    %510 = arith.cmpf olt, %509, %37 : vector<8x256xf32>
    %511 = arith.extui %510 : vector<8x256xi1> to vector<8x256xi32>
    %512 = arith.sitofp %511 : vector<8x256xi32> to vector<8x256xf32>
    %513 = arith.addf %496, %508 : vector<8x256xf32>
    %514 = arith.addf %497, %512 : vector<8x256xf32>
    %c28_i32 = arith.constant 28 : i32
    %c8_i32_98 = arith.constant 8 : i32
    %515 = arith.muli %c28_i32, %c8_i32_98 : i32
    %516 = tpu.assume_multiple %515, 8 : i32
    %c0_99 = arith.constant 0 : index
    %517 = arith.index_cast %516 : i32 to index
    %c0_100 = arith.constant 0 : index
    %518 = vector.load %arg3[%c0_99, %517, %c0_100] : memref<1x256x2xf32, #tpu.memory_space<vmem>>, vector<1x8x2xf32>
    %519 = vector.shape_cast %518 : vector<1x8x2xf32> to vector<8x2xf32>
    %520 = vector.extract_strided_slice %519 {offsets = [0, 0], sizes = [8, 1], strides = [1, 1]} : vector<8x2xf32> to vector<8x1xf32>
    %521 = vector.extract_strided_slice %519 {offsets = [0, 1], sizes = [8, 1], strides = [1, 1]} : vector<8x2xf32> to vector<8x1xf32>
    %522 = vector.broadcast %520 : vector<8x1xf32> to vector<8x256xf32>
    %523 = arith.cmpf olt, %522, %35 : vector<8x256xf32>
    %524 = arith.extui %523 : vector<8x256xi1> to vector<8x256xi32>
    %525 = arith.sitofp %524 : vector<8x256xi32> to vector<8x256xf32>
    %526 = vector.broadcast %521 : vector<8x1xf32> to vector<8x256xf32>
    %527 = arith.cmpf olt, %526, %37 : vector<8x256xf32>
    %528 = arith.extui %527 : vector<8x256xi1> to vector<8x256xi32>
    %529 = arith.sitofp %528 : vector<8x256xi32> to vector<8x256xf32>
    %530 = arith.addf %513, %525 : vector<8x256xf32>
    %531 = arith.addf %514, %529 : vector<8x256xf32>
    %c29_i32 = arith.constant 29 : i32
    %c8_i32_101 = arith.constant 8 : i32
    %532 = arith.muli %c29_i32, %c8_i32_101 : i32
    %533 = tpu.assume_multiple %532, 8 : i32
    %c0_102 = arith.constant 0 : index
    %534 = arith.index_cast %533 : i32 to index
    %c0_103 = arith.constant 0 : index
    %535 = vector.load %arg3[%c0_102, %534, %c0_103] : memref<1x256x2xf32, #tpu.memory_space<vmem>>, vector<1x8x2xf32>
    %536 = vector.shape_cast %535 : vector<1x8x2xf32> to vector<8x2xf32>
    %537 = vector.extract_strided_slice %536 {offsets = [0, 0], sizes = [8, 1], strides = [1, 1]} : vector<8x2xf32> to vector<8x1xf32>
    %538 = vector.extract_strided_slice %536 {offsets = [0, 1], sizes = [8, 1], strides = [1, 1]} : vector<8x2xf32> to vector<8x1xf32>
    %539 = vector.broadcast %537 : vector<8x1xf32> to vector<8x256xf32>
    %540 = arith.cmpf olt, %539, %35 : vector<8x256xf32>
    %541 = arith.extui %540 : vector<8x256xi1> to vector<8x256xi32>
    %542 = arith.sitofp %541 : vector<8x256xi32> to vector<8x256xf32>
    %543 = vector.broadcast %538 : vector<8x1xf32> to vector<8x256xf32>
    %544 = arith.cmpf olt, %543, %37 : vector<8x256xf32>
    %545 = arith.extui %544 : vector<8x256xi1> to vector<8x256xi32>
    %546 = arith.sitofp %545 : vector<8x256xi32> to vector<8x256xf32>
    %547 = arith.addf %530, %542 : vector<8x256xf32>
    %548 = arith.addf %531, %546 : vector<8x256xf32>
    %c30_i32 = arith.constant 30 : i32
    %c8_i32_104 = arith.constant 8 : i32
    %549 = arith.muli %c30_i32, %c8_i32_104 : i32
    %550 = tpu.assume_multiple %549, 8 : i32
    %c0_105 = arith.constant 0 : index
    %551 = arith.index_cast %550 : i32 to index
    %c0_106 = arith.constant 0 : index
    %552 = vector.load %arg3[%c0_105, %551, %c0_106] : memref<1x256x2xf32, #tpu.memory_space<vmem>>, vector<1x8x2xf32>
    %553 = vector.shape_cast %552 : vector<1x8x2xf32> to vector<8x2xf32>
    %554 = vector.extract_strided_slice %553 {offsets = [0, 0], sizes = [8, 1], strides = [1, 1]} : vector<8x2xf32> to vector<8x1xf32>
    %555 = vector.extract_strided_slice %553 {offsets = [0, 1], sizes = [8, 1], strides = [1, 1]} : vector<8x2xf32> to vector<8x1xf32>
    %556 = vector.broadcast %554 : vector<8x1xf32> to vector<8x256xf32>
    %557 = arith.cmpf olt, %556, %35 : vector<8x256xf32>
    %558 = arith.extui %557 : vector<8x256xi1> to vector<8x256xi32>
    %559 = arith.sitofp %558 : vector<8x256xi32> to vector<8x256xf32>
    %560 = vector.broadcast %555 : vector<8x1xf32> to vector<8x256xf32>
    %561 = arith.cmpf olt, %560, %37 : vector<8x256xf32>
    %562 = arith.extui %561 : vector<8x256xi1> to vector<8x256xi32>
    %563 = arith.sitofp %562 : vector<8x256xi32> to vector<8x256xf32>
    %564 = arith.addf %547, %559 : vector<8x256xf32>
    %565 = arith.addf %548, %563 : vector<8x256xf32>
    %c31_i32 = arith.constant 31 : i32
    %c8_i32_107 = arith.constant 8 : i32
    %566 = arith.muli %c31_i32, %c8_i32_107 : i32
    %567 = tpu.assume_multiple %566, 8 : i32
    %c0_108 = arith.constant 0 : index
    %568 = arith.index_cast %567 : i32 to index
    %c0_109 = arith.constant 0 : index
    %569 = vector.load %arg3[%c0_108, %568, %c0_109] : memref<1x256x2xf32, #tpu.memory_space<vmem>>, vector<1x8x2xf32>
    %570 = vector.shape_cast %569 : vector<1x8x2xf32> to vector<8x2xf32>
    %571 = vector.extract_strided_slice %570 {offsets = [0, 0], sizes = [8, 1], strides = [1, 1]} : vector<8x2xf32> to vector<8x1xf32>
    %572 = vector.extract_strided_slice %570 {offsets = [0, 1], sizes = [8, 1], strides = [1, 1]} : vector<8x2xf32> to vector<8x1xf32>
    %573 = vector.broadcast %571 : vector<8x1xf32> to vector<8x256xf32>
    %574 = arith.cmpf olt, %573, %35 : vector<8x256xf32>
    %575 = arith.extui %574 : vector<8x256xi1> to vector<8x256xi32>
    %576 = arith.sitofp %575 : vector<8x256xi32> to vector<8x256xf32>
    %577 = vector.broadcast %572 : vector<8x1xf32> to vector<8x256xf32>
    %578 = arith.cmpf olt, %577, %37 : vector<8x256xf32>
    %579 = arith.extui %578 : vector<8x256xi1> to vector<8x256xi32>
    %580 = arith.sitofp %579 : vector<8x256xi32> to vector<8x256xf32>
    %581 = arith.addf %564, %576 : vector<8x256xf32>
    %582 = arith.addf %565, %580 : vector<8x256xf32>
    %c32_i32 = arith.constant 32 : i32
    %cst_110 = arith.constant dense<0.000000e+00> : vector<256xf32>
    %583 = vector.multi_reduction <add>, %581, %cst_110 [0] : vector<8x256xf32> to vector<256xf32>
    %584 = vector.shape_cast %583 : vector<256xf32> to vector<1x256xf32>
    %cst_111 = arith.constant dense<0.000000e+00> : vector<256xf32>
    %585 = vector.multi_reduction <add>, %582, %cst_111 [0] : vector<8x256xf32> to vector<256xf32>
    %586 = vector.shape_cast %585 : vector<256xf32> to vector<1x256xf32>
    %cst_112 = arith.constant 1.275000e+02 : f32
    %587 = vector.broadcast %cst_112 : f32 to vector<1x256xf32>
    %588 = arith.subf %586, %587 : vector<1x256xf32>
    %cst_113 = arith.constant 1.275000e+02 : f32
    %589 = vector.broadcast %cst_113 : f32 to vector<1x256xf32>
    %590 = arith.subf %584, %589 : vector<1x256xf32>
    %591 = arith.mulf %588, %590 : vector<1x256xf32>
    %cst_114 = arith.constant dense<0.000000e+00> : vector<1xf32>
    %592 = vector.multi_reduction <add>, %591, %cst_114 [1] : vector<1x256xf32> to vector<1xf32>
    %593 = vector.shape_cast %592 : vector<1xf32> to vector<1x1xf32>
    %594 = arith.mulf %588, %588 : vector<1x256xf32>
    %cst_115 = arith.constant dense<0.000000e+00> : vector<1xf32>
    %595 = vector.multi_reduction <add>, %594, %cst_115 [1] : vector<1x256xf32> to vector<1xf32>
    %596 = vector.shape_cast %595 : vector<1xf32> to vector<1x1xf32>
    %597 = arith.mulf %590, %590 : vector<1x256xf32>
    %cst_116 = arith.constant dense<0.000000e+00> : vector<1xf32>
    %598 = vector.multi_reduction <add>, %597, %cst_116 [1] : vector<1x256xf32> to vector<1xf32>
    %599 = vector.shape_cast %598 : vector<1xf32> to vector<1x1xf32>
    %600 = arith.mulf %596, %599 : vector<1x1xf32>
    %601 = math.rsqrt %600 : vector<1x1xf32>
    %602 = arith.mulf %593, %601 : vector<1x1xf32>
    %cst_117 = arith.constant 1.000000e-01 : f32
    %603 = vector.broadcast %cst_117 : f32 to vector<1x1xf32>
    %604 = arith.mulf %9, %603 : vector<1x1xf32>
    %605 = arith.mulf %33, %33 : vector<1x1xf32>
    %606 = arith.addf %605, %602 : vector<1x1xf32>
    %607 = arith.subf %604, %606 : vector<1x1xf32>
    %608 = tpu.iota {dimensions = array<i32: 1>} : vector<1x128xi32>
    %c0_i32_118 = arith.constant 0 : i32
    %609 = vector.broadcast %c0_i32_118 : i32 to vector<1x128xi32>
    %610 = arith.cmpi eq, %608, %609 : vector<1x128xi32>
    %cst_119 = arith.constant 0.000000e+00 : f32
    %611 = vector.shape_cast %607 : vector<1x1xf32> to vector<1x1xf32>
    %612 = vector.broadcast %611 : vector<1x1xf32> to vector<1x128xf32>
    %613 = vector.broadcast %cst_119 : f32 to vector<1x128xf32>
    %614 = arith.select %610, %612, %613 : vector<1x128xi1>, vector<1x128xf32>
    %c1_i32_120 = arith.constant 1 : i32
    %615 = vector.broadcast %c1_i32_120 : i32 to vector<1x128xi32>
    %616 = arith.cmpi eq, %608, %615 : vector<1x128xi32>
    %cst_121 = arith.constant 0.000000e+00 : f32
    %617 = vector.shape_cast %33 : vector<1x1xf32> to vector<1x1xf32>
    %618 = vector.broadcast %617 : vector<1x1xf32> to vector<1x128xf32>
    %619 = vector.broadcast %cst_121 : f32 to vector<1x128xf32>
    %620 = arith.select %616, %618, %619 : vector<1x128xi1>, vector<1x128xf32>
    %621 = arith.addf %614, %620 : vector<1x128xf32>
    %c2_i32_122 = arith.constant 2 : i32
    %622 = vector.broadcast %c2_i32_122 : i32 to vector<1x128xi32>
    %623 = arith.cmpi eq, %608, %622 : vector<1x128xi32>
    %cst_123 = arith.constant 0.000000e+00 : f32
    %624 = vector.shape_cast %602 : vector<1x1xf32> to vector<1x1xf32>
    %625 = vector.broadcast %624 : vector<1x1xf32> to vector<1x128xf32>
    %626 = vector.broadcast %cst_123 : f32 to vector<1x128xf32>
    %627 = arith.select %623, %625, %626 : vector<1x128xi1>, vector<1x128xf32>
    %628 = arith.addf %621, %627 : vector<1x128xf32>
    %c0_124 = arith.constant 0 : index
    %c0_125 = arith.constant 0 : index
    %c0_126 = arith.constant 0 : index
    %629 = vector.load %arg4[%c0_124, %c0_125, %c0_126] : memref<1x1x128xf32, #tpu.memory_space<vmem>>, vector<1x1x128xf32>
    %630 = vector.shape_cast %629 : vector<1x1x128xf32> to vector<1x128xf32>
    %631 = vector.shape_cast %628 : vector<1x128xf32> to vector<1x1x128xf32>
    tpu.vector_store %arg4[%c0_124, %c0_125, %c0_126], %631 {strides = array<i32>} : memref<1x1x128xf32, #tpu.memory_space<vmem>>, vector<1x1x128xf32>,
    return
  }
  func.func @transform_0(%arg0: i32) -> (i32, i32, i32) {
    %c0_i32 = arith.constant 0 : i32
    %c0_i32_0 = arith.constant 0 : i32
    %c0_i32_1 = arith.constant 0 : i32
    return %arg0, %c0_i32, %c0_i32_0 : i32, i32, i32
  }
  func.func @transform_1(%arg0: i32) -> (i32, i32, i32) {
    %c0_i32 = arith.constant 0 : i32
    %c0_i32_0 = arith.constant 0 : i32
    %c0_i32_1 = arith.constant 0 : i32
    return %arg0, %c0_i32, %c0_i32_0 : i32, i32, i32
  }
  func.func @transform_2(%arg0: i32) -> (i32, i32, i32) {
    %c0_i32 = arith.constant 0 : i32
    %c0_i32_0 = arith.constant 0 : i32
    %c0_i32_1 = arith.constant 0 : i32
    return %arg0, %c0_i32, %c0_i32_0 : i32, i32, i32
  }
  func.func @transform_3(%arg0: i32) -> (i32, i32, i32) {
    %c0_i32 = arith.constant 0 : i32
    %c0_i32_0 = arith.constant 0 : i32
    %c0_i32_1 = arith.constant 0 : i32
    return %arg0, %c0_i32, %c0_i32_0 : i32, i32, i32
  }
}

</mosaic_0001>

<bundles_post_ra>
// kernel: _ccloss_batched.1
= control target key start
LH: loop header
LB: loop body
LE: loop exit
PB: predicated region body
PF: predicated region fallthrough
CT: control target
= control target key end

     0   :  { %s1559_s12 = smov 0   ;;  %s2138_s0 = inlined_call_operand.vmem [shape: f32[4,1,256], index: 0, kind: input, shape index: {}]   ;;  %s2139_s1 = inlined_call_operand.vmem [shape: f32[4,1,256], index: 1, kind: input, shape index: {}]   ;;  %s2140_s2 = inlined_call_operand.vmem [shape: f32[4,256,2], index: 2, kind: input, shape index: {}]   ;;  %s2141_s3 = inlined_call_operand.vmem [shape: f32[4,1,128], index: 3, kind: output, shape index: {}]  }
   0x1 LB: > { %s1303_s13 = sadd.s32 4294967295, %s1533_s12   ;;  %p1307_p0 = scmp.ge.s32.totalorder %s1533_s12, 1  ;;  %s1533_s12 = sphi %s1559_s12, %s13_s12  }
   0x2   : > { %p155_p1 = scmp.lt.s32.totalorder %s1533_s12, 5 }
   0x4   : > { %p156_p2 = pnand %p1307_p0, %p155_p1 }
   0x5   : > { %p185_p3 = scmp.lt.s32.totalorder (!%p156_p2), %s1303_s13, 3 }
   0x6   : > { %159 = sbr.rel (%p156_p2) target bundleno = 596 (0x254), region = 32 }
   0xb   : > { %v1535_v0 = vmov 0   ;;  %v1536_v1 = vmov 1   ;;  %s2143_s13 = smov (!%p185_p3, %s1303_s13), 3  ;;  %vm210_vm0 = vcmask 1040384   ;;  %v1537_v40 = vmov 256.0  }
   0xc   : > { %1492 = vset.pattern.permute.xlu2 %v1535_v0  ;;  %1491 = vset.pattern.permute.xlu1 %v1536_v1  ;;  %s1477_s14 = sshll.u32 %s2143_s13, 8  ;;  %s1308_s15 = sshll.u32 %s2143_s13, 1  ;;  %1521 = vrcp.f32 %v1537_v40 }
   0xd   : > { %1490 = vset.pattern.permute.xlu0 %v1535_v0  ;;  %s1577_s18 = scalar_lea.vmem %s2140_s2, %s1477_s14  ;;  %s188_s21 = scalar_lea.vmem %s2138_s0, %s1308_s15 }
   0xe   : > { %v1316_v2 = vld [vmem:[%s1577_s18 + $0x8] sm:$0xff]  ;;  %s192_s24 = scalar_lea.vmem %s2139_s1, %s1308_s15  ;;  %v1586_v3 = vld [vmem:[%s188_s21] sm:$0x3]  ;;  %v1321_v22 = vld [vmem:[%s1577_s18 + $0x10] sm:$0xff]  ;;  %s200_s27 = scalar_lea.vmem %s2141_s3, %s2143_s13 }
   0xf   : > { %329 = vperm.xlu2 %1492, %v1316_v2   ;;  %v1588_v4 = vld [vmem:[%s192_s24] sm:$0x3]  ;;  %v1591_v5 = vperm.slane %v1586_v3, 0  ;;  %v1594_v6 = vperm.slane %v1586_v3, 1  ;;  %v1336_v25 = vld [vmem:[%s1577_s18 + $0x28] sm:$0xff]  ;;  %v1341_v26 = vld [vmem:[%s1577_s18 + $0x30] sm:$0xff] }
  0x10   : > { %v1597_v7 = vperm.slane %v1588_v4, 0  ;;  %v1600_v8 = vperm.slane %v1588_v4, 1  ;;  %v203_v9 = vsub.f32 %v1586_v3, %v1588_v4  ;;  %v1331_v23 = vld [vmem:[%s1577_s18 + $0x20] sm:$0xff]  ;;  %v1326_v27 = vld [vmem:[%s1577_s18 + $0x18] sm:$0xff]  ;;  %v1356_v31 = vld [vmem:[%s1577_s18 + $0x48] sm:$0xff] }
  0x11   : > { %v229_v10 = vsel %vm210_vm0, %v1591_v5, 0.0  ;;  %v230_v11 = vsel %vm210_vm0, %v1594_v6, 0.0  ;;  %v299_v24 = vld [vmem:[%s1577_s18] sm:$0xff]  ;;  %v1366_v28 = vld [vmem:[%s1577_s18 + $0x58] sm:$0xff]  ;;  %v1631_v32 = vld [vmem:[%s1577_s18 + $0xa8] sm:$0xff] }
  0x12   : > { %v244_v12 = vsel %vm210_vm0, %v1597_v7, 0.0  ;;  %v245_v13 = vsel %vm210_vm0, %v1600_v8, 0.0  ;;  %v231_v14 = vadd.f32 %v230_v11, %v229_v10  ;;  %v204_v15 = vmul.f32 %v203_v9, %v203_v9  ;;  %v1346_v29 = vld [vmem:[%s1577_s18 + $0x38] sm:$0xff]  ;;  %v1391_v30 = vld [vmem:[%s1577_s18 + $0x80] sm:$0xff]  ;;  %v1361_v33 = vld [vmem:[%s1577_s18 + $0x50] sm:$0xff]  ;;  %v1522_v41 = vpop.eup %1521 }
  0x13   : > { %v246_v16 = vadd.f32 %v245_v13, %v244_v12  ;;  %v1636_v34 = vld [vmem:[%s1577_s18 + $0xd0] sm:$0xff]  ;;  %v1351_v35 = vld [vmem:[%s1577_s18 + $0x40] sm:$0xff]  ;;  %v1376_v38 = vld [vmem:[%s1577_s18 + $0x68] sm:$0xff]  ;;  %v217_v42 = vmul.f32 256.0, %v1522_v41  ;;  %vm221_vm1 = vweird.f32 %v1522_v41  ;;  %v1538_v11 = vmov 0.0  }
  0x14   : > { %232 = vadd.xlane.f32.xlu0 %v231_v14  ;;  %v206_v17 = vperm.slane %v204_v15, 0  ;;  %v207_v18 = vperm.slane %v204_v15, 1  ;;  %v1371_v36 = vld [vmem:[%s1577_s18 + $0x60] sm:$0xff]  ;;  %v1381_v37 = vld [vmem:[%s1577_s18 + $0x70] sm:$0xff]  ;;  %v1386_v39 = vld [vmem:[%s1577_s18 + $0x78] sm:$0xff] }
  0x15   : > { %247 = vadd.xlane.f32.xlu1 %v246_v16  ;;  %v218_v44 = vsub.f32 1.0, %v217_v42  ;;  %v1662_v60 = vld [vmem:[%s1577_s18 + $0x88] sm:$0xff]  ;;  %v1665_v61 = vld [vmem:[%s1577_s18 + $0x90] sm:$0xff] }
  0x16   : > { %v211_v19 = vsel %vm210_vm0, %v206_v17, 0.0  ;;  %v212_v20 = vsel %vm210_vm0, %v207_v18, 0.0 }
  0x17   : > { %1493 = vset.pattern.permute.xlu2 %v1536_v1  ;;  %v213_v21 = vadd.f32 %v212_v20, %v211_v19  ;;  %v219_v45 = vmul.f32 %v1522_v41, %v218_v44 }
  0x18   : > { %339 = vperm.xlu2 %1493, %v1316_v2  }
  0x19   : > { %v220_v46 = vadd.f32 %v1522_v41, %v219_v45 }
  0x1b   : > { %v222_v49 = vsel %vm221_vm1, %v1522_v41, %v220_v46 }
  0x1c   : > { %214 = vadd.xlane.f32.xlu0 %v213_v21 }
  0x20   : > { %366 = vperm.xlu2 %1493, %v1321_v22  }
  0x28   : > { %1495 = vset.pattern.permute.xlu2 %v1535_v0 }
  0x29   : > { %410 = vperm.xlu2 %1495, %v1331_v23  }
  0x2e   : > { %312 = vperm.xlu1 %1491, %v299_v24  }
  0x30   : > { %302 = vperm.xlu0 %1490, %v299_v24  }
  0x31   : > { %437 = vperm.xlu2 %1495, %v1336_v25  }
  0x36   : > { %1494 = vset.pattern.permute.xlu1 %v1535_v0 }
  0x37   : > { %356 = vperm.xlu1 %1494, %v1321_v22  }
  0x38   : > { %464 = vperm.xlu0 %1490, %v1341_v26  }
  0x39   : > { %1497 = vset.pattern.permute.xlu2 %v1536_v1 }
  0x3a   : > { %474 = vperm.xlu2 %1497, %v1341_v26  }
  0x3f   : > { %383 = vperm.xlu1 %1494, %v1326_v27  }
  0x40   : > { %599 = vperm.xlu0 %1490, %v1366_v28  }
  0x42   : > { %501 = vperm.xlu2 %1497, %v1346_v29  }
  0x47   : > { %1496 = vset.pattern.permute.xlu1 %v1536_v1 }
  0x48   : > { %420 = vperm.xlu1 %1496, %v1331_v23   ;;  %734 = vperm.xlu0 %1490, %v1391_v30  }
  0x4a   : > { %1499 = vset.pattern.permute.xlu2 %v1535_v0 }
  0x4b   : > { %545 = vperm.xlu2 %1499, %v1356_v31  }
  0x50   : > { %447 = vperm.xlu1 %1496, %v1336_v25   ;;  %869 = vperm.xlu0 %1490, %v1631_v32  }
  0x53   : > { %572 = vperm.xlu2 %1499, %v1361_v33  }
  0x58   : > { %1498 = vset.pattern.permute.xlu1 %v1535_v0  ;;  %1004 = vperm.xlu0 %1490, %v1636_v34  }
  0x59   : > { %491 = vperm.xlu1 %1498, %v1346_v29  }
  0x5b   : > { %1501 = vset.pattern.permute.xlu2 %v1536_v1 }
  0x5c   : > { %609 = vperm.xlu2 %1501, %v1366_v28  }
  0x60   : > { %1513 = vset.pattern.permute.xlu0 %v1536_v1 }
  0x61   : > { %518 = vperm.xlu1 %1498, %v1351_v35   ;;  %393 = vperm.xlu0 %1513, %v1326_v27  }
  0x64   : > { %636 = vperm.xlu2 %1501, %v1371_v36  }
  0x69   : > { %1500 = vset.pattern.permute.xlu1 %v1536_v1  ;;  %528 = vperm.xlu0 %1513, %v1351_v35   ;;  %v1651_v43 = vpop.permute.xlu2 %329 }
  0x6a   : > { %555 = vperm.xlu1 %1500, %v1356_v31   ;;  %vm332_vm10 = vcmp.lt.f32.partialorder %v1651_v43, %v1591_v5  ;;  %vm333_vm11 = vcmp.lt.f32.partialorder %v1651_v43, %v1594_v6 }
  0x6b   : > { %v1318_v35 = vsel %vm333_vm11, 1.0, %v1538_v11 }
  0x6c   : > { %1503 = vset.pattern.permute.xlu2 %v1535_v0 }
  0x6d   : > { %680 = vperm.xlu2 %1503, %v1381_v37  }
  0x71   : > { %663 = vperm.xlu0 %1513, %v1376_v38  }
  0x72   : > { %582 = vperm.xlu1 %1500, %v1361_v33   ;;  %v340_v48 = vpop.permute.xlu2 %339  ;;  %v1317_v33 = vsel %vm332_vm10, 1.0, %v1538_v11 }
  0x73   : > { %vm342_vm2 = vcmp.lt.f32.partialorder %v340_v48, %v1597_v7  ;;  %vm343_vm3 = vcmp.lt.f32.partialorder %v340_v48, %v1600_v8 }
  0x74   : > { %v1319_v12 = vsel %vm342_vm2, 1.0, %v1538_v11  ;;  %v1320_v13 = vsel %vm343_vm3, 1.0, %v1538_v11 }
  0x75   : > { %707 = vperm.xlu2 %1503, %v1386_v39  }
  0x79   : > { %798 = vperm.xlu0 %1513, %v1665_v61  }
  0x7a   : > { %1502 = vset.pattern.permute.xlu1 %v1535_v0  ;;  %v367_v54 = vpop.permute.xlu2 %366 }
  0x7b   : > { %626 = vperm.xlu1 %1502, %v1371_v36   ;;  %vm369_vm4 = vcmp.lt.f32.partialorder %v367_v54, %v1597_v7  ;;  %vm370_vm5 = vcmp.lt.f32.partialorder %v367_v54, %v1600_v8 }
  0x7c   : > { %v1324_v18 = vsel %vm369_vm4, 1.0, %v1538_v11  ;;  %v1325_v19 = vsel %vm370_vm5, 1.0, %v1538_v11 }
  0x7d   : > { %1505 = vset.pattern.permute.xlu2 %v1536_v1 }
  0x7e   : > { %744 = vperm.xlu2 %1505, %v1391_v30  }
  0x83   : > { %653 = vperm.xlu1 %1502, %v1376_v38   ;;  %v1667_v62 = vpop.permute.xlu2 %410 }
  0x84   : > { %vm413_vm14 = vcmp.lt.f32.partialorder %v1667_v62, %v1591_v5  ;;  %vm414_vm15 = vcmp.lt.f32.partialorder %v1667_v62, %v1594_v6 }
  0x85   : > { %v1333_v54 = vsel %vm414_vm15, 1.0, %v1538_v11 }
  0x87   : > { %v233_v47 = vpop.xlane.xlu0 %232 }
  0x88   : > { %v248_v50 = vpop.xlane.xlu1 %247  ;;  %v234_v57 = vmul.f32 %v233_v47, %v222_v49 }
  0x89   : > { %v249_v51 = vmul.f32 %v248_v50, %v222_v49 }
  0x8a   : > { %v236_v59 = vperm.slane %v234_v57, 0 }
  0x8b   : > { %1504 = vset.pattern.permute.xlu1 %v1536_v1  ;;  %v251_v55 = vperm.slane %v249_v51, 0  ;;  %v438_v25 = vpop.permute.xlu2 %437 }
  0x8c   : > { %690 = vperm.xlu1 %1504, %v1381_v37   ;;  %v1674_v63 = vsub.f32 %v1586_v3, %v236_v59  ;;  %vm440_vm3 = vcmp.lt.f32.partialorder %v438_v25, %v1591_v5  ;;  %vm441_vm4 = vcmp.lt.f32.partialorder %v438_v25, %v1594_v6 }
  0x8d   : > { %v1657_v56 = vsub.f32 %v1588_v4, %v251_v55  ;;  %v1338_v59 = vsel %vm441_vm4, 1.0, %v1538_v11 }
  0x8e   : > { %v276_v9 = vmul.f32 %v1674_v63, %v1674_v63 }
  0x8f   : > { %v215_v52 = vpop.xlane.xlu0 %214  ;;  %v265_v58 = vmul.f32 %v1657_v56, %v1657_v56 }
  0x90   : > { %v1654_v53 = vmul.f32 %v222_v49, %v215_v52  ;;  %v278_v22 = vperm.slane %v276_v9, 0  ;;  %v279_v23 = vperm.slane %v276_v9, 1  ;;  %v1332_v52 = vsel %vm413_vm14, 1.0, %v1538_v11 }
  0x91   : > { %v267_v2 = vperm.slane %v265_v58, 0  ;;  %v268_v4 = vperm.slane %v265_v58, 1  ;;  %v1337_v58 = vsel %vm440_vm3, 1.0, %v1538_v11  ;;  %v254_v9 = vmul.f32 %v1657_v56, %v1674_v63 }
  0x92   : > { %v282_v30 = vsel %vm210_vm0, %v278_v22, 0.0  ;;  %v283_v31 = vsel %vm210_vm0, %v279_v23, 0.0 }
  0x93   : > { %v271_v16 = vsel %vm210_vm0, %v267_v2, 0.0  ;;  %v272_v17 = vsel %vm210_vm0, %v268_v4, 0.0  ;;  %v284_v42 = vadd.f32 %v283_v31, %v282_v30  ;;  %v1753_v30 = vld [vmem:[%s1577_s18 + $0x98] sm:$0xff] }
  0x94   : > { %717 = vperm.xlu1 %1504, %v1386_v39   ;;  %v273_v24 = vadd.f32 %v272_v17, %v271_v16  ;;  %v1711_v45 = vpop.permute.xlu2 %474 }
  0x9c   : > { %1506 = vset.pattern.permute.xlu1 %v1535_v0  ;;  %v1729_v4 = vpop.permute.xlu2 %501 }
  0x9d   : > { %761 = vperm.xlu1 %1506, %v1662_v60   ;;  %vm504_vm10 = vcmp.lt.f32.partialorder %v1729_v4, %v1597_v7  ;;  %vm505_vm11 = vcmp.lt.f32.partialorder %v1729_v4, %v1600_v8 }
  0xa0   : > { %v313_v10 = vpop.permute.xlu1 %312 }
  0xa1   : > { %vm315_vm6 = vcmp.lt.f32.partialorder %v313_v10, %v1597_v7  ;;  %vm316_vm7 = vcmp.lt.f32.partialorder %v313_v10, %v1600_v8 }
  0xa2   : > { %v1314_v3 = vsel %vm315_vm6, 1.0, %v1538_v11  ;;  %v1315_v14 = vsel %vm316_vm7, 1.0, %v1538_v11  ;;  %v303_v15 = vpop.permute.xlu0 %302 }
  0xa3   : > { %v350_v20 = vadd.f32 %v1319_v12, %v1314_v3  ;;  %v351_v21 = vadd.f32 %v1320_v13, %v1315_v14  ;;  %vm305_vm8 = vcmp.lt.f32.partialorder %v303_v15, %v1591_v5  ;;  %vm306_vm9 = vcmp.lt.f32.partialorder %v303_v15, %v1594_v6 }
  0xa4   : > { %v1312_v28 = vsel %vm305_vm8, 1.0, %v1538_v11  ;;  %v1313_v29 = vsel %vm306_vm9, 1.0, %v1538_v11  ;;  %v256_v13 = vperm.slane %v254_v9, 0  ;;  %v257_v3 = vperm.slane %v254_v9, 1 }
  0xa5   : > { %v1693_v26 = vadd.f32 %v1324_v18, %v350_v20  ;;  %v1695_v27 = vadd.f32 %v1325_v19, %v351_v21  ;;  %v348_v37 = vadd.f32 %v1317_v33, %v1312_v28  ;;  %v349_v38 = vadd.f32 %v1318_v35, %v1313_v29  ;;  %v546_v18 = vpop.permute.xlu2 %545 }
  0xa6   : > { %v260_v16 = vsel %vm210_vm0, %v256_v13, 0.0  ;;  %v261_v17 = vsel %vm210_vm0, %v257_v3, 0.0  ;;  %vm477_vm8 = vcmp.lt.f32.partialorder %v1711_v45, %v1597_v7  ;;  %vm478_vm9 = vcmp.lt.f32.partialorder %v1711_v45, %v1600_v8 }
  0xa7   : > { %274 = vadd.xlane.f32.xlu2 %v273_v24  ;;  %v262_v19 = vadd.f32 %v261_v17, %v260_v16  ;;  %v1344_v13 = vsel %vm477_vm8, 1.0, %v1538_v11  ;;  %v1345_v3 = vsel %vm478_vm9, 1.0, %v1538_v11  ;;  %v1350_v45 = vsel %vm505_vm11, 1.0, %v1538_v11 }
  0xa9   : > { %v357_v36 = vpop.permute.xlu1 %356 }
  0xaa   : > { %vm359_vm12 = vcmp.lt.f32.partialorder %v357_v36, %v1591_v5  ;;  %vm360_vm13 = vcmp.lt.f32.partialorder %v357_v36, %v1594_v6  ;;  %v465_v39 = vpop.permute.xlu0 %464 }
  0xab   : > { %v1322_v40 = vsel %vm359_vm12, 1.0, %v1538_v11  ;;  %v1323_v41 = vsel %vm360_vm13, 1.0, %v1538_v11  ;;  %vm467_vm5 = vcmp.lt.f32.partialorder %v465_v39, %v1591_v5  ;;  %vm468_vm6 = vcmp.lt.f32.partialorder %v465_v39, %v1594_v6 }
  0xac   : > { %v375_v43 = vadd.f32 %v1322_v40, %v348_v37  ;;  %v376_v44 = vadd.f32 %v1323_v41, %v349_v38  ;;  %v1342_v56 = vsel %vm467_vm5, 1.0, %v1538_v11  ;;  %v1343_v63 = vsel %vm468_vm6, 1.0, %v1538_v11 }
  0xad   : > { %v573_v28 = vpop.permute.xlu2 %572  ;;  %vm548_vm12 = vcmp.lt.f32.partialorder %v546_v18, %v1591_v5  ;;  %vm549_vm13 = vcmp.lt.f32.partialorder %v546_v18, %v1594_v6 }
  0xae   : > { %vm575_vm14 = vcmp.lt.f32.partialorder %v573_v28, %v1591_v5  ;;  %vm576_vm15 = vcmp.lt.f32.partialorder %v573_v28, %v1594_v6 }
  0xaf   : > { %285 = vadd.xlane.f32.xlu2 %v284_v42 }
  0xb1   : > { %v384_v46 = vpop.permute.xlu1 %383 }
  0xb2   : > { %vm386_vm1 = vcmp.lt.f32.partialorder %v384_v46, %v1591_v5  ;;  %vm387_vm2 = vcmp.lt.f32.partialorder %v384_v46, %v1594_v6  ;;  %v1719_v47 = vpop.permute.xlu0 %599  ;;  %v1357_v46 = vsel %vm548_vm12, 1.0, %v1538_v11 }
  0xb3   : > { %v1327_v48 = vsel %vm386_vm1, 1.0, %v1538_v11  ;;  %v1328_v49 = vsel %vm387_vm2, 1.0, %v1538_v11 }
  0xb4   : > { %v402_v50 = vadd.f32 %v1327_v48, %v375_v43  ;;  %v403_v51 = vadd.f32 %v1328_v49, %v376_v44  ;;  %v1358_v48 = vsel %vm549_vm13, 1.0, %v1538_v11  ;;  %v1798_v49 = vld [vmem:[%s1577_s18 + $0xa0] sm:$0xff] }
  0xb6   : > { %v429_v55 = vadd.f32 %v1332_v52, %v402_v50  ;;  %v430_v57 = vadd.f32 %v1333_v54, %v403_v51 }
  0xb8   : > { %v456_v62 = vadd.f32 %v1337_v58, %v429_v55  ;;  %v457_v2 = vadd.f32 %v1338_v59, %v430_v57  ;;  %v1362_v57 = vsel %vm575_vm14, 1.0, %v1538_v11  ;;  %v1363_v58 = vsel %vm576_vm15, 1.0, %v1538_v11  ;;  %v1816_v59 = vld [vmem:[%s1577_s18 + $0xb8] sm:$0xff] }
  0xb9   : > { %933 = vperm.xlu0 %1513, %v1816_v59  }
  0xba   : > { %v421_v10 = vpop.permute.xlu1 %420  ;;  %v1733_v12 = vpop.permute.xlu0 %734  ;;  %v483_v22 = vadd.f32 %v1342_v56, %v456_v62  ;;  %v484_v23 = vadd.f32 %v1343_v63, %v457_v2 }
  0xbb   : > { %vm423_vm1 = vcmp.lt.f32.partialorder %v421_v10, %v1597_v7  ;;  %vm424_vm2 = vcmp.lt.f32.partialorder %v421_v10, %v1600_v8 }
  0xbc   : > { %v1334_v43 = vsel %vm423_vm1, 1.0, %v1538_v11  ;;  %v1335_v44 = vsel %vm424_vm2, 1.0, %v1538_v11 }
  0xc2   : > { %v1735_v14 = vpop.permute.xlu1 %447  ;;  %v1737_v15 = vpop.permute.xlu0 %869 }
  0xc3   : > { %vm450_vm3 = vcmp.lt.f32.partialorder %v1735_v14, %v1597_v7  ;;  %vm451_vm4 = vcmp.lt.f32.partialorder %v1735_v14, %v1600_v8 }
  0xc4   : > { %v1339_v54 = vsel %vm450_vm3, 1.0, %v1538_v11  ;;  %v1340_v55 = vsel %vm451_vm4, 1.0, %v1538_v11  ;;  %vm602_vm3 = vcmp.lt.f32.partialorder %v1719_v47, %v1591_v5  ;;  %vm603_vm4 = vcmp.lt.f32.partialorder %v1719_v47, %v1594_v6 }
  0xc5   : > { %v1367_v47 = vsel %vm602_vm3, 1.0, %v1538_v11 }
  0xc7   : > { %263 = vadd.xlane.f32.xlu1 %v262_v19  ;;  %771 = vperm.xlu2 %1505, %v1662_v60   ;;  %v1349_v19 = vsel %vm504_vm10, 1.0, %v1538_v11 }
  0xca   : > { %v1746_v20 = vpop.permute.xlu0 %1004 }
  0xcb   : > { %v492_v21 = vpop.permute.xlu1 %491 }
  0xcc   : > { %vm494_vm0 = vcmp.lt.f32.partialorder %v492_v21, %v1591_v5  ;;  %vm495_vm7 = vcmp.lt.f32.partialorder %v492_v21, %v1594_v6 }
  0xcd   : > { %v1347_v24 = vsel %vm494_vm0, 1.0, %v1538_v11  ;;  %v1348_v25 = vsel %vm495_vm7, 1.0, %v1538_v11 }
  0xce   : > { %v510_v29 = vadd.f32 %v1347_v24, %v483_v22  ;;  %v511_v60 = vadd.f32 %v1348_v25, %v484_v23 }
  0xcf   : > { %1507 = vset.pattern.permute.xlu2 %v1535_v0 }
  0xd0   : > { %815 = vperm.xlu2 %1507, %v1753_v30  }
  0xd3   : > { %v519_v31 = vpop.permute.xlu1 %518  ;;  %v394_v33 = vpop.permute.xlu0 %393 }
  0xd4   : > { %vm521_vm5 = vcmp.lt.f32.partialorder %v519_v31, %v1591_v5  ;;  %vm522_vm6 = vcmp.lt.f32.partialorder %v519_v31, %v1594_v6  ;;  %vm396_vm0 = vcmp.lt.f32.partialorder %v394_v33, %v1597_v7  ;;  %vm397_vm7 = vcmp.lt.f32.partialorder %v394_v33, %v1600_v8 }
  0xd5   : > { %v1352_v35 = vsel %vm521_vm5, 1.0, %v1538_v11  ;;  %v1353_v36 = vsel %vm522_vm6, 1.0, %v1538_v11  ;;  %v1329_v37 = vsel %vm396_vm0, 1.0, %v1538_v11  ;;  %v1330_v38 = vsel %vm397_vm7, 1.0, %v1538_v11 }
  0xd6   : > { %v537_v39 = vadd.f32 %v1352_v35, %v510_v29  ;;  %v538_v40 = vadd.f32 %v1353_v36, %v511_v60  ;;  %v404_v41 = vadd.f32 %v1329_v37, %v1693_v26  ;;  %v405_v42 = vadd.f32 %v1330_v38, %v1695_v27  ;;  %v610_v26 = vpop.permute.xlu2 %609  ;;  %v1846_v29 = vld [vmem:[%s1577_s18 + $0xe0] sm:$0xff] }
  0xd7   : > { %1068 = vperm.xlu0 %1513, %v1846_v29   ;;  %vm612_vm10 = vcmp.lt.f32.partialorder %v610_v26, %v1597_v7  ;;  %vm613_vm11 = vcmp.lt.f32.partialorder %v610_v26, %v1600_v8 }
  0xd8   : > { %v564_v27 = vadd.f32 %v1357_v46, %v537_v39  ;;  %v565_v50 = vadd.f32 %v1358_v48, %v538_v40  ;;  %v431_v51 = vadd.f32 %v1334_v43, %v404_v41  ;;  %v432_v52 = vadd.f32 %v1335_v44, %v405_v42  ;;  %842 = vperm.xlu2 %1507, %v1798_v49   ;;  %v1421_v39 = vld [vmem:[%s1577_s18 + $0xb0] sm:$0xff] }
  0xd9   : > { %v1369_v37 = vsel %vm612_vm10, 1.0, %v1538_v11  ;;  %v1370_v38 = vsel %vm613_vm11, 1.0, %v1538_v11  ;;  %v1368_v44 = vsel %vm603_vm4, 1.0, %v1538_v11 }
  0xda   : > { %v458_v62 = vadd.f32 %v1339_v54, %v431_v51  ;;  %v459_v2 = vadd.f32 %v1340_v55, %v432_v52  ;;  %v591_v9 = vadd.f32 %v1362_v57, %v564_v27  ;;  %v592_v10 = vadd.f32 %v1363_v58, %v565_v50  ;;  %v1431_v57 = vld [vmem:[%s1577_s18 + $0xc0] sm:$0xff] }
  0xdb   : > { %v529_v14 = vpop.permute.xlu0 %528 }
  0xdc   : > { %v556_v16 = vpop.permute.xlu1 %555  ;;  %v485_v17 = vadd.f32 %v1344_v13, %v458_v62  ;;  %v486_v18 = vadd.f32 %v1345_v3, %v459_v2  ;;  %vm531_vm12 = vcmp.lt.f32.partialorder %v529_v14, %v1597_v7  ;;  %vm532_vm13 = vcmp.lt.f32.partialorder %v529_v14, %v1600_v8 }
  0xdd   : > { %v1354_v56 = vsel %vm531_vm12, 1.0, %v1538_v11  ;;  %v1355_v63 = vsel %vm532_vm13, 1.0, %v1538_v11  ;;  %vm558_vm8 = vcmp.lt.f32.partialorder %v556_v16, %v1597_v7  ;;  %vm559_vm9 = vcmp.lt.f32.partialorder %v556_v16, %v1600_v8  ;;  %v1436_v16 = vld [vmem:[%s1577_s18 + $0xc8] sm:$0xff] }
  0xde   : > { %v512_v21 = vadd.f32 %v1349_v19, %v485_v17  ;;  %v513_v22 = vadd.f32 %v1350_v45, %v486_v18  ;;  %v1359_v25 = vsel %vm558_vm8, 1.0, %v1538_v11  ;;  %v1360_v4 = vsel %vm559_vm9, 1.0, %v1538_v11  ;;  %v637_v28 = vpop.permute.xlu2 %636 }
  0xdf   : > { %vm639_vm1 = vcmp.lt.f32.partialorder %v637_v28, %v1597_v7  ;;  %vm640_vm2 = vcmp.lt.f32.partialorder %v637_v28, %v1600_v8  ;;  %1518 = vset.pattern.permute.xlu0 %v1535_v0  ;;  %v618_v50 = vadd.f32 %v1367_v47, %v591_v9  ;;  %v619_v51 = vadd.f32 %v1368_v44, %v592_v10  ;;  %v1461_v47 = vld [vmem:[%s1577_s18 + $0xf0] sm:$0xff] }
  0xe0   : > { %v539_v23 = vadd.f32 %v1354_v56, %v512_v21  ;;  %v540_v24 = vadd.f32 %v1355_v63, %v513_v22  ;;  %788 = vperm.xlu1 %1506, %v1665_v61   ;;  %1509 = vset.pattern.permute.xlu2 %v1536_v1  ;;  %v1374_v42 = vsel %vm639_vm1, 1.0, %v1538_v11  ;;  %v1375_v43 = vsel %vm640_vm2, 1.0, %v1538_v11 }
  0xe1   : > { %879 = vperm.xlu2 %1509, %v1631_v32  }
  0xe2   : > { %v566_v60 = vadd.f32 %v1359_v25, %v539_v23  ;;  %v567_v31 = vadd.f32 %v1360_v4, %v540_v24 }
  0xe3   : > { %v664_v2 = vpop.permute.xlu0 %663 }
  0xe4   : > { %v583_v33 = vpop.permute.xlu1 %582  ;;  %vm666_vm10 = vcmp.lt.f32.partialorder %v664_v2, %v1597_v7  ;;  %vm667_vm11 = vcmp.lt.f32.partialorder %v664_v2, %v1600_v8 }
  0xe5   : > { %vm585_vm14 = vcmp.lt.f32.partialorder %v583_v33, %v1597_v7  ;;  %vm586_vm15 = vcmp.lt.f32.partialorder %v583_v33, %v1600_v8  ;;  %v1379_v56 = vsel %vm666_vm10, 1.0, %v1538_v11  ;;  %v1380_v63 = vsel %vm667_vm11, 1.0, %v1538_v11 }
  0xe6   : > { %v1364_v61 = vsel %vm585_vm14, 1.0, %v1538_v11  ;;  %v1365_v35 = vsel %vm586_vm15, 1.0, %v1538_v11  ;;  %v681_v46 = vpop.permute.xlu2 %680 }
  0xe7   : > { %v593_v32 = vadd.f32 %v1364_v61, %v566_v60  ;;  %v594_v36 = vadd.f32 %v1365_v35, %v567_v31  ;;  %vm683_vm0 = vcmp.lt.f32.partialorder %v681_v46, %v1591_v5  ;;  %vm684_vm7 = vcmp.lt.f32.partialorder %v681_v46, %v1594_v6 }
  0xe8   : > { %1508 = vset.pattern.permute.xlu1 %v1536_v1  ;;  %v1382_v3 = vsel %vm683_vm0, 1.0, %v1538_v11  ;;  %v1383_v14 = vsel %vm684_vm7, 1.0, %v1538_v11 }
  0xe9   : > { %v620_v40 = vadd.f32 %v1369_v37, %v593_v32  ;;  %v621_v41 = vadd.f32 %v1370_v38, %v594_v36  ;;  %825 = vperm.xlu1 %1508, %v1753_v30   ;;  %906 = vperm.xlu2 %1509, %v1421_v39   ;;  %v1446_v38 = vld [vmem:[%s1577_s18 + $0xd8] sm:$0xff] }
  0xeb   : > { %v647_v48 = vadd.f32 %v1374_v42, %v620_v40  ;;  %v648_v26 = vadd.f32 %v1375_v43, %v621_v41  ;;  %v1466_v41 = vld [vmem:[%s1577_s18 + $0xf8] sm:$0xff]  ;;  %v1456_v42 = vld [vmem:[%s1577_s18 + $0xe8] sm:$0xff] }
  0xec   : > { %1139 = vperm.xlu0 %1518, %v1466_v41  }
  0xed   : > { %v627_v27 = vpop.permute.xlu1 %626  ;;  %v674_v24 = vadd.f32 %v1379_v56, %v647_v48  ;;  %v675_v25 = vadd.f32 %v1380_v63, %v648_v26 }
  0xee   : > { %vm629_vm5 = vcmp.lt.f32.partialorder %v627_v27, %v1591_v5  ;;  %vm630_vm6 = vcmp.lt.f32.partialorder %v627_v27, %v1594_v6  ;;  %v708_v58 = vpop.permute.xlu2 %707 }
  0xef   : > { %v1372_v30 = vsel %vm629_vm5, 1.0, %v1538_v11  ;;  %v1373_v52 = vsel %vm630_vm6, 1.0, %v1538_v11  ;;  %vm710_vm8 = vcmp.lt.f32.partialorder %v708_v58, %v1591_v5  ;;  %vm711_vm9 = vcmp.lt.f32.partialorder %v708_v58, %v1594_v6 }
  0xf0   : > { %v645_v54 = vadd.f32 %v1372_v30, %v618_v50  ;;  %v646_v55 = vadd.f32 %v1373_v52, %v619_v51  ;;  %v1387_v19 = vsel %vm710_vm8, 1.0, %v1538_v11  ;;  %v1388_v45 = vsel %vm711_vm9, 1.0, %v1538_v11 }
  0xf1   : > { %852 = vperm.xlu1 %1508, %v1798_v49   ;;  %1511 = vset.pattern.permute.xlu2 %v1535_v0  ;;  %vm738_vm8 = vcmp.lt.f32.partialorder %v1733_v12, %v1594_v6 }
  0xf2   : > { %950 = vperm.xlu2 %1511, %v1431_v57  }
  0xf4   : > { %1520 = vset.pattern.permute.xlu0 %v1536_v1 }
  0xf5   : > { %v654_v62 = vpop.permute.xlu1 %653 }
  0xf6   : > { %vm656_vm12 = vcmp.lt.f32.partialorder %v654_v62, %v1591_v5  ;;  %vm657_vm13 = vcmp.lt.f32.partialorder %v654_v62, %v1594_v6  ;;  %v745_v33 = vpop.permute.xlu2 %744 }
  0xf7   : > { %v1377_v9 = vsel %vm656_vm12, 1.0, %v1538_v11  ;;  %v1378_v49 = vsel %vm657_vm13, 1.0, %v1538_v11  ;;  %vm747_vm1 = vcmp.lt.f32.partialorder %v745_v33, %v1597_v7  ;;  %vm748_vm2 = vcmp.lt.f32.partialorder %v745_v33, %v1600_v8  ;;  %v799_v33 = vpop.permute.xlu0 %798 }
  0xf8   : > { %v672_v10 = vadd.f32 %v1377_v9, %v645_v54  ;;  %v673_v13 = vadd.f32 %v1378_v49, %v646_v55  ;;  %v1395_v37 = vsel %vm748_vm2, 1.0, %v1538_v11  ;;  %vm737_vm13 = vcmp.lt.f32.partialorder %v1733_v12, %v1591_v5 }
  0xf9   : > { %1510 = vset.pattern.permute.xlu1 %v1535_v0  ;;  %vm801_vm2 = vcmp.lt.f32.partialorder %v799_v33, %v1597_v7 }
  0xfa   : > { %v699_v17 = vadd.f32 %v1382_v3, %v672_v10  ;;  %v700_v18 = vadd.f32 %v1383_v14, %v673_v13  ;;  %896 = vperm.xlu1 %1510, %v1421_v39   ;;  %977 = vperm.xlu2 %1511, %v1436_v16  }
  0xfc   : > { %v1897_v21 = vadd.f32 %v1387_v19, %v699_v17  ;;  %v1899_v22 = vadd.f32 %v1388_v45, %v700_v18  ;;  %v1392_v19 = vsel %vm737_vm13, 1.0, %v1538_v11  ;;  %v1393_v45 = vsel %vm738_vm8, 1.0, %v1538_v11 }
  0xfe   : > { %v691_v23 = vpop.permute.xlu1 %690  ;;  %v754_v12 = vadd.f32 %v1393_v45, %v1899_v22 }
  0xff   : > { %vm693_vm14 = vcmp.lt.f32.partialorder %v691_v23, %v1597_v7  ;;  %vm694_vm15 = vcmp.lt.f32.partialorder %v691_v23, %v1600_v8  ;;  %v753_v23 = vadd.f32 %v1392_v19, %v1897_v21 }
 0x100   : > { %v1384_v4 = vsel %vm693_vm14, 1.0, %v1538_v11  ;;  %v1385_v28 = vsel %vm694_vm15, 1.0, %v1538_v11 }
 0x101   : > { %v701_v60 = vadd.f32 %v1384_v4, %v674_v24  ;;  %v702_v31 = vadd.f32 %v1385_v28, %v675_v25 }
 0x102   : > { %923 = vperm.xlu1 %1510, %v1816_v59   ;;  %1514 = vset.pattern.permute.xlu2 %v1536_v1 }
 0x103   : > { %1014 = vperm.xlu2 %1514, %v1636_v34   ;;  %v1394_v34 = vsel %vm747_vm1, 1.0, %v1538_v11 }
 0x106   : > { %v718_v61 = vpop.permute.xlu1 %717 }
 0x107   : > { %vm720_vm3 = vcmp.lt.f32.partialorder %v718_v61, %v1597_v7  ;;  %vm721_vm4 = vcmp.lt.f32.partialorder %v718_v61, %v1600_v8 }
 0x108   : > { %v1389_v35 = vsel %vm720_vm3, 1.0, %v1538_v11  ;;  %v1390_v59 = vsel %vm721_vm4, 1.0, %v1538_v11  ;;  %vm802_vm3 = vcmp.lt.f32.partialorder %v799_v33, %v1600_v8 }
 0x109   : > { %v728_v32 = vadd.f32 %v1389_v35, %v701_v60  ;;  %v729_v36 = vadd.f32 %v1390_v59, %v702_v31 }
 0x10a   : > { %1512 = vset.pattern.permute.xlu1 %v1536_v1 }
 0x10b   : > { %960 = vperm.xlu1 %1512, %v1431_v57   ;;  %v755_v39 = vadd.f32 %v1394_v34, %v728_v32  ;;  %v756_v40 = vadd.f32 %v1395_v37, %v729_v36  ;;  %1041 = vperm.xlu2 %1514, %v1446_v38   ;;  %v1404_v34 = vsel %vm801_vm2, 1.0, %v1538_v11  ;;  %v1405_v37 = vsel %vm802_vm3, 1.0, %v1538_v11 }
 0x10f   : > { %v762_v54 = vpop.permute.xlu1 %761 }
 0x110   : > { %vm764_vm9 = vcmp.lt.f32.partialorder %v762_v54, %v1591_v5  ;;  %vm765_vm10 = vcmp.lt.f32.partialorder %v762_v54, %v1594_v6 }
 0x111   : > { %v1397_v56 = vsel %vm764_vm9, 1.0, %v1538_v11  ;;  %v1398_v63 = vsel %vm765_vm10, 1.0, %v1538_v11 }
 0x112   : > { %v780_v60 = vadd.f32 %v1397_v56, %v753_v23  ;;  %v781_v31 = vadd.f32 %v1398_v63, %v754_v12 }
 0x113   : > { %987 = vperm.xlu1 %1512, %v1436_v16   ;;  %1516 = vset.pattern.permute.xlu2 %v1535_v0 }
 0x114   : > { %1085 = vperm.xlu2 %1516, %v1456_v42  }
 0x11a   : > { %v275_v43 = vpop.xlane.xlu2 %274 }
 0x11b   : > { %1515 = vset.pattern.permute.xlu1 %v1535_v0 }
 0x11c   : > { %1031 = vperm.xlu1 %1515, %v1446_v38   ;;  %1112 = vperm.xlu2 %1516, %v1461_v47  }
 0x122   : > { %v286_v44 = vpop.xlane.xlu2 %285 }
 0x123   : > { %v287_v46 = vmul.f32 %v286_v44, %v275_v43 }
 0x124   : > { %1058 = vperm.xlu1 %1515, %v1846_v29   ;;  %1519 = vset.pattern.permute.xlu2 %v1536_v1 }
 0x125   : > { %1523 = vrsqrt.f32 %v287_v46  ;;  %1149 = vperm.xlu2 %1519, %v1466_v41   ;;  %vm294_vm7 = vweird.f32 %v287_v46 }
 0x12a   : > { %v772_v48 = vpop.permute.xlu2 %771 }
 0x12b   : > { %v1524_v26 = vpop.eup %1523  ;;  %vm774_vm5 = vcmp.lt.f32.partialorder %v772_v48, %v1597_v7  ;;  %vm775_vm6 = vcmp.lt.f32.partialorder %v772_v48, %v1600_v8 }
 0x12c   : > { %v289_v27 = vmul.f32 %v1524_v26, %v287_v46  ;;  %v1399_v0 = vsel %vm774_vm5, 1.0, %v1538_v11  ;;  %v1400_v50 = vsel %vm775_vm6, 1.0, %v1538_v11  ;;  %1517 = vset.pattern.permute.xlu1 %v1536_v1  ;;  %vm295_vm0 = vweird.f32 %v1524_v26 }
 0x12d   : > { %v1931_v51 = vadd.f32 %v1399_v0, %v755_v39  ;;  %v1933_v29 = vadd.f32 %v1400_v50, %v756_v40  ;;  %1095 = vperm.xlu1 %1517, %v1456_v42   ;;  %vm296_vm12 = vmor %vm294_vm7, %vm295_vm0  ;;  %vm872_vm6 = vcmp.lt.f32.partialorder %v1737_v15, %v1591_v5  ;;  %vm873_vm0 = vcmp.lt.f32.partialorder %v1737_v15, %v1594_v6  ;;  %v934_v0 = vpop.permute.xlu0 %933 }
 0x12e   : > { %v290_v30 = vmul.f32 %v1524_v26, %v289_v27  ;;  %v1417_v41 = vsel %vm872_vm6, 1.0, %v1538_v11  ;;  %v1418_v15 = vsel %vm873_vm0, 1.0, %v1538_v11 }
 0x12f   : > { %v810_v44 = vadd.f32 %v1405_v37, %v1933_v29 }
 0x130   : > { %v291_v52 = vmul.f32 0.5, %v290_v30 }
 0x132   : > { %v292_v55 = vsub.f32 1.5, %v291_v52  ;;  %v816_v58 = vpop.permute.xlu2 %815 }
 0x133   : > { %vm818_vm15 = vcmp.lt.f32.partialorder %v816_v58, %v1591_v5  ;;  %vm819_vm1 = vcmp.lt.f32.partialorder %v816_v58, %v1594_v6 }
 0x134   : > { %v293_v57 = vmul.f32 %v1524_v26, %v292_v55  ;;  %v1407_v21 = vsel %vm818_vm15, 1.0, %v1538_v11  ;;  %v1408_v22 = vsel %vm819_vm1, 1.0, %v1538_v11 }
 0x135   : > { %1122 = vperm.xlu1 %1517, %v1461_v47   ;;  %v809_v47 = vadd.f32 %v1404_v34, %v1931_v51 }
 0x136   : > { %v297_v62 = vsel %vm296_vm12, %v1524_v26, %v293_v57 }
 0x13a   : > { %v264_v2 = vpop.xlane.xlu1 %263  ;;  %v843_v1 = vpop.permute.xlu2 %842 }
 0x13b   : > { %v1935_v9 = vmul.f32 %v297_v62, %v264_v2  ;;  %vm845_vm4 = vcmp.lt.f32.partialorder %v843_v1, %v1591_v5  ;;  %vm846_vm5 = vcmp.lt.f32.partialorder %v843_v1, %v1594_v6 }
 0x13c   : > { %v1412_v38 = vsel %vm845_vm4, 1.0, %v1538_v11  ;;  %v1413_v39 = vsel %vm846_vm5, 1.0, %v1538_v11  ;;  %vm1007_vm4 = vcmp.lt.f32.partialorder %v1746_v20, %v1591_v5  ;;  %vm1008_vm5 = vcmp.lt.f32.partialorder %v1746_v20, %v1594_v6 }
 0x13d   : > { %v1442_v20 = vsel %vm1007_vm4, 1.0, %v1538_v11 }
 0x142   : > { %v1937_v49 = vpop.permute.xlu2 %879 }
 0x14a   : > { %v1939_v13 = vpop.permute.xlu2 %906 }
 0x14b   : > { %vm909_vm6 = vcmp.lt.f32.partialorder %v1939_v13, %v1597_v7  ;;  %vm910_vm0 = vcmp.lt.f32.partialorder %v1939_v13, %v1600_v8 }
 0x14c   : > { %v1425_v13 = vsel %vm910_vm0, 1.0, %v1538_v11 }
 0x152   : > { %v789_v10 = vpop.permute.xlu1 %788  ;;  %v1941_v14 = vpop.permute.xlu2 %950 }
 0x153   : > { %vm791_vm11 = vcmp.lt.f32.partialorder %v789_v10, %v1591_v5  ;;  %vm792_vm14 = vcmp.lt.f32.partialorder %v789_v10, %v1594_v6  ;;  %vm953_vm2 = vcmp.lt.f32.partialorder %v1941_v14, %v1591_v5  ;;  %vm954_vm3 = vcmp.lt.f32.partialorder %v1941_v14, %v1594_v6 }
 0x154   : > { %v1402_v25 = vsel %vm791_vm11, 1.0, %v1538_v11  ;;  %v1403_v4 = vsel %vm792_vm14, 1.0, %v1538_v11  ;;  %vm882_vm11 = vcmp.lt.f32.partialorder %v1937_v49, %v1597_v7  ;;  %vm883_vm14 = vcmp.lt.f32.partialorder %v1937_v49, %v1600_v8 }
 0x155   : > { %v807_v61 = vadd.f32 %v1402_v25, %v780_v60  ;;  %v808_v35 = vadd.f32 %v1403_v4, %v781_v31  ;;  %v1432_v45 = vsel %vm953_vm2, 1.0, %v1538_v11  ;;  %v1433_v56 = vsel %vm954_vm3, 1.0, %v1538_v11  ;;  %v2045_v4 = vpop.permute.xlu0 %1068 }
 0x156   : > { %v1424_v25 = vsel %vm909_vm6, 1.0, %v1538_v11 }
 0x157   : > { %v834_v59 = vadd.f32 %v1407_v21, %v807_v61  ;;  %v835_v32 = vadd.f32 %v1408_v22, %v808_v35 }
 0x159   : > { %v861_v42 = vadd.f32 %v1412_v38, %v834_v59  ;;  %v862_v43 = vadd.f32 %v1413_v39, %v835_v32 }
 0x15a   : > { %v1943_v17 = vpop.permute.xlu2 %977 }
 0x15b   : > { %v826_v3 = vpop.permute.xlu1 %825  ;;  %v888_v52 = vadd.f32 %v1417_v41, %v861_v42  ;;  %v889_v54 = vadd.f32 %v1418_v15, %v862_v43 }
 0x15c   : > { %vm828_vm7 = vcmp.lt.f32.partialorder %v826_v3, %v1597_v7  ;;  %vm829_vm12 = vcmp.lt.f32.partialorder %v826_v3, %v1600_v8  ;;  %v1419_v3 = vsel %vm882_vm11, 1.0, %v1538_v11 }
 0x15d   : > { %v1409_v46 = vsel %vm828_vm7, 1.0, %v1538_v11  ;;  %v1410_v48 = vsel %vm829_vm12, 1.0, %v1538_v11  ;;  %vm936_vm7 = vcmp.lt.f32.partialorder %v934_v0, %v1597_v7  ;;  %vm937_vm12 = vcmp.lt.f32.partialorder %v934_v0, %v1600_v8 }
 0x15e   : > { %v836_v29 = vadd.f32 %v1409_v46, %v809_v47  ;;  %v837_v30 = vadd.f32 %v1410_v48, %v810_v44  ;;  %v1429_v61 = vsel %vm936_vm7, 1.0, %v1538_v11  ;;  %v1430_v35 = vsel %vm937_vm12, 1.0, %v1538_v11 }
 0x162   : > { %v1963_v28 = vpop.permute.xlu2 %1014 }
 0x163   : > { %v853_v16 = vpop.permute.xlu1 %852  ;;  %vm1017_vm2 = vcmp.lt.f32.partialorder %v1963_v28, %v1597_v7  ;;  %vm1018_vm3 = vcmp.lt.f32.partialorder %v1963_v28, %v1600_v8 }
 0x164   : > { %vm855_vm13 = vcmp.lt.f32.partialorder %v853_v16, %v1597_v7  ;;  %vm856_vm8 = vcmp.lt.f32.partialorder %v853_v16, %v1600_v8  ;;  %v1420_v16 = vsel %vm883_vm14, 1.0, %v1538_v11 }
 0x165   : > { %v1414_v26 = vsel %vm855_vm13, 1.0, %v1538_v11  ;;  %v1415_v27 = vsel %vm856_vm8, 1.0, %v1538_v11  ;;  %vm980_vm13 = vcmp.lt.f32.partialorder %v1943_v17, %v1591_v5  ;;  %vm981_vm8 = vcmp.lt.f32.partialorder %v1943_v17, %v1594_v6 }
 0x166   : > { %v863_v62 = vadd.f32 %v1414_v26, %v836_v29  ;;  %v864_v2 = vadd.f32 %v1415_v27, %v837_v30  ;;  %v1437_v21 = vsel %vm980_vm13, 1.0, %v1538_v11  ;;  %v1438_v17 = vsel %vm981_vm8, 1.0, %v1538_v11  ;;  %v1140_v26 = vpop.permute.xlu0 %1139 }
 0x167   : > { %vm1142_vm13 = vcmp.lt.f32.partialorder %v1140_v26, %v1591_v5  ;;  %vm1143_vm8 = vcmp.lt.f32.partialorder %v1140_v26, %v1594_v6 }
 0x168   : > { %v890_v63 = vadd.f32 %v1419_v3, %v863_v62  ;;  %v891_v23 = vadd.f32 %v1420_v16, %v864_v2  ;;  %v1445_v62 = vsel %vm1018_vm3, 1.0, %v1538_v11  ;;  %v1467_v16 = vsel %vm1142_vm13, 1.0, %v1538_v11 }
 0x16a   : > { %v1985_v40 = vpop.permute.xlu2 %1041  ;;  %v917_v31 = vadd.f32 %v1424_v25, %v890_v63  ;;  %v918_v33 = vadd.f32 %v1425_v13, %v891_v23 }
 0x16c   : > { %v1945_v18 = vpop.permute.xlu1 %896  ;;  %v944_v32 = vadd.f32 %v1429_v61, %v917_v31  ;;  %v945_v34 = vadd.f32 %v1430_v35, %v918_v33 }
 0x16d   : > { %vm899_vm9 = vcmp.lt.f32.partialorder %v1945_v18, %v1591_v5  ;;  %vm900_vm10 = vcmp.lt.f32.partialorder %v1945_v18, %v1594_v6 }
 0x16e   : > { %v1422_v50 = vsel %vm899_vm9, 1.0, %v1538_v11  ;;  %v1423_v51 = vsel %vm900_vm10, 1.0, %v1538_v11 }
 0x16f   : > { %v915_v1 = vadd.f32 %v1422_v50, %v888_v52  ;;  %v916_v10 = vadd.f32 %v1423_v51, %v889_v54 }
 0x172   : > { %v1086_v19 = vpop.permute.xlu2 %1085 }
 0x173   : > { %vm1088_vm9 = vcmp.lt.f32.partialorder %v1086_v19, %v1591_v5  ;;  %vm1089_vm10 = vcmp.lt.f32.partialorder %v1086_v19, %v1594_v6 }
 0x174   : > { %v924_v24 = vpop.permute.xlu1 %923  ;;  %v1458_v41 = vsel %vm1089_vm10, 1.0, %v1538_v11  ;;  %vm1045_vm10 = vcmp.lt.f32.partialorder %v1985_v40, %v1600_v8 }
 0x175   : > { %vm926_vm15 = vcmp.lt.f32.partialorder %v924_v24, %v1591_v5  ;;  %vm927_vm1 = vcmp.lt.f32.partialorder %v924_v24, %v1594_v6  ;;  %v1443_v24 = vsel %vm1008_vm5, 1.0, %v1538_v11  ;;  %v1450_v23 = vsel %vm1045_vm10, 1.0, %v1538_v11 }
 0x176   : > { %v1427_v57 = vsel %vm926_vm15, 1.0, %v1538_v11  ;;  %v1428_v58 = vsel %vm927_vm1, 1.0, %v1538_v11 }
 0x177   : > { %v942_v18 = vadd.f32 %v1427_v57, %v915_v1  ;;  %v943_v14 = vadd.f32 %v1428_v58, %v916_v10  ;;  %v1444_v58 = vsel %vm1017_vm2, 1.0, %v1538_v11 }
 0x179   : > { %v969_v49 = vadd.f32 %v1432_v45, %v942_v18  ;;  %v970_v12 = vadd.f32 %v1433_v56, %v943_v14  ;;  %v1468_v18 = vsel %vm1143_vm8, 1.0, %v1538_v11 }
 0x17a   : > { %v1113_v37 = vpop.permute.xlu2 %1112 }
 0x17b   : > { %v996_v22 = vadd.f32 %v1437_v21, %v969_v49  ;;  %v997_v59 = vadd.f32 %v1438_v17, %v970_v12  ;;  %vm1115_vm6 = vcmp.lt.f32.partialorder %v1113_v37, %v1591_v5  ;;  %vm1116_vm0 = vcmp.lt.f32.partialorder %v1113_v37, %v1594_v6 }
 0x17c   : > { %v1462_v10 = vsel %vm1115_vm6, 1.0, %v1538_v11  ;;  %v1463_v3 = vsel %vm1116_vm0, 1.0, %v1538_v11 }
 0x17d   : > { %v1977_v36 = vpop.permute.xlu1 %960  ;;  %v1023_v43 = vadd.f32 %v1442_v20, %v996_v22  ;;  %v1024_v47 = vadd.f32 %v1443_v24, %v997_v59 }
 0x17e   : > { %vm963_vm15 = vcmp.lt.f32.partialorder %v1977_v36, %v1597_v7  ;;  %vm964_vm1 = vcmp.lt.f32.partialorder %v1977_v36, %v1600_v8  ;;  %v1457_v36 = vsel %vm1088_vm9, 1.0, %v1538_v11  ;;  %vm1044_vm9 = vcmp.lt.f32.partialorder %v1985_v40, %v1597_v7 }
 0x17f   : > { %v1434_v15 = vsel %vm963_vm15, 1.0, %v1538_v11  ;;  %v1435_v42 = vsel %vm964_vm1, 1.0, %v1538_v11 }
 0x180   : > { %v971_v50 = vadd.f32 %v1434_v15, %v944_v32  ;;  %v972_v51 = vadd.f32 %v1435_v42, %v945_v34 }
 0x182   : > { %v1150_v20 = vpop.permute.xlu2 %1149 }
 0x183   : > { %vm1152_vm2 = vcmp.lt.f32.partialorder %v1150_v20, %v1597_v7  ;;  %vm1153_vm3 = vcmp.lt.f32.partialorder %v1150_v20, %v1600_v8  ;;  %v1221_v20 = vlaneseq }
 0x184   : > { %v1469_v34 = vsel %vm1152_vm2, 1.0, %v1538_v11  ;;  %v1470_v37 = vsel %vm1153_vm3, 1.0, %v1538_v11 }
 0x185   : > { %v2009_v55 = vpop.permute.xlu1 %987 }
 0x186   : > { %vm990_vm4 = vcmp.lt.f32.partialorder %v2009_v55, %v1597_v7  ;;  %vm991_vm5 = vcmp.lt.f32.partialorder %v2009_v55, %v1600_v8 }
 0x187   : > { %v1439_v44 = vsel %vm990_vm4, 1.0, %v1538_v11  ;;  %v1440_v46 = vsel %vm991_vm5, 1.0, %v1538_v11 }
 0x188   : > { %v998_v55 = vadd.f32 %v1439_v44, %v971_v50  ;;  %v999_v57 = vadd.f32 %v1440_v46, %v972_v51 }
 0x18a   : > { %v1025_v45 = vadd.f32 %v1444_v58, %v998_v55  ;;  %v1026_v56 = vadd.f32 %v1445_v62, %v999_v57 }
 0x18c   : > { %v1053_v25 = vadd.f32 %v1450_v23, %v1026_v56 }
 0x18e   : > { %v1032_v60 = vpop.permute.xlu1 %1031 }
 0x18f   : > { %vm1034_vm11 = vcmp.lt.f32.partialorder %v1032_v60, %v1591_v5  ;;  %vm1035_vm14 = vcmp.lt.f32.partialorder %v1032_v60, %v1594_v6 }
 0x190   : > { %v1447_v38 = vsel %vm1034_vm11, 1.0, %v1538_v11  ;;  %v1448_v39 = vsel %vm1035_vm14, 1.0, %v1538_v11  ;;  %vm1071_vm11 = vcmp.lt.f32.partialorder %v2045_v4, %v1597_v7  ;;  %vm1072_vm14 = vcmp.lt.f32.partialorder %v2045_v4, %v1600_v8 }
 0x191   : > { %v1050_v27 = vadd.f32 %v1447_v38, %v1023_v43  ;;  %v1051_v0 = vadd.f32 %v1448_v39, %v1024_v47  ;;  %v1454_v60 = vsel %vm1071_vm11, 1.0, %v1538_v11  ;;  %v1455_v31 = vsel %vm1072_vm14, 1.0, %v1538_v11 }
 0x192   : > { %v1080_v17 = vadd.f32 %v1455_v31, %v1053_v25  ;;  %v1218_v31 = vmul.f32 %v1935_v9, %v1935_v9 }
 0x196   : > { %v1059_v48 = vpop.permute.xlu1 %1058 }
 0x197   : > { %vm1061_vm7 = vcmp.lt.f32.partialorder %v1059_v48, %v1591_v5  ;;  %vm1062_vm12 = vcmp.lt.f32.partialorder %v1059_v48, %v1594_v6  ;;  %v1449_v6 = vsel %vm1044_vm9, 1.0, %v1538_v11 }
 0x198   : > { %v1452_v29 = vsel %vm1061_vm7, 1.0, %v1538_v11  ;;  %v1453_v30 = vsel %vm1062_vm12, 1.0, %v1538_v11  ;;  %v1052_v24 = vadd.f32 %v1449_v6, %v1025_v45 }
 0x199   : > { %v1077_v52 = vadd.f32 %v1452_v29, %v1050_v27  ;;  %v1078_v54 = vadd.f32 %v1453_v30, %v1051_v0 }
 0x19a   : > { %v1079_v21 = vadd.f32 %v1454_v60, %v1052_v24 }
 0x19b   : > { %v1104_v2 = vadd.f32 %v1457_v36, %v1077_v52  ;;  %v1105_v1 = vadd.f32 %v1458_v41, %v1078_v54 }
 0x19d   : > { %v1131_v14 = vadd.f32 %v1462_v10, %v1104_v2  ;;  %v1132_v19 = vadd.f32 %v1463_v3, %v1105_v1 }
 0x19f   : > { %v1158_v5 = vadd.f32 %v1467_v16, %v1131_v14  ;;  %v1159_v28 = vadd.f32 %v1468_v18, %v1132_v19  ;;  %v1096_v63 = vpop.permute.xlu1 %1095 }
 0x1a0   : > { %vm1098_vm15 = vcmp.lt.f32.partialorder %v1096_v63, %v1597_v7  ;;  %vm1099_vm1 = vcmp.lt.f32.partialorder %v1096_v63, %v1600_v8 }
 0x1a1   : > { %v1162_v49 = vrot.slane %v1158_v5, 4  ;;  %v1168_v12 = vrot.slane %v1159_v28, 4  ;;  %v1459_v61 = vsel %vm1098_vm15, 1.0, %v1538_v11  ;;  %v1460_v35 = vsel %vm1099_vm1, 1.0, %v1538_v11 }
 0x1a2   : > { %v1106_v38 = vadd.f32 %v1459_v61, %v1079_v21  ;;  %v1107_v39 = vadd.f32 %v1460_v35, %v1080_v17 }
 0x1a3   : > { %v1163_v40 = vadd.f32 %v1162_v49, %v1158_v5  ;;  %v1169_v13 = vadd.f32 %v1168_v12, %v1159_v28 }
 0x1a5   : > { %v1164_v4 = vrot.slane %v1163_v40, 2  ;;  %v1170_v33 = vrot.slane %v1169_v13, 2 }
 0x1a7   : > { %v1165_v22 = vadd.f32 %v1164_v4, %v1163_v40  ;;  %v1171_v59 = vadd.f32 %v1170_v33, %v1169_v13  ;;  %v1123_v32 = vpop.permute.xlu1 %1122  ;;  %v1222_v40 = vand.u32 127, %v1221_v20  ;;  %v1217_v33 = vmul.f32 0.1, %v1654_v53 }
 0x1a8   : > { %vm1125_vm4 = vcmp.lt.f32.partialorder %v1123_v32, %v1597_v7  ;;  %vm1126_vm5 = vcmp.lt.f32.partialorder %v1123_v32, %v1600_v8 }
 0x1a9   : > { %v1464_v36 = vsel %vm1125_vm4, 1.0, %v1538_v11  ;;  %v1465_v41 = vsel %vm1126_vm5, 1.0, %v1538_v11  ;;  %v1166_v15 = vrot.slane %v1165_v22, 1  ;;  %v1172_v42 = vrot.slane %v1171_v59, 1 }
 0x1aa   : > { %v1133_v43 = vadd.f32 %v1464_v36, %v1106_v38  ;;  %v1134_v47 = vadd.f32 %v1465_v41, %v1107_v39  ;;  %vm1225_vm12 = vcmp.eq.s32.totalorder %v1222_v40, 1  ;;  %vm1223_vm13 = vcmp.eq.s32.totalorder %v1222_v40, 0 }
 0x1ab   : > { %v1167_v44 = vadd.f32 %v1166_v15, %v1165_v22  ;;  %v1173_v46 = vadd.f32 %v1172_v42, %v1171_v59  ;;  %vm1228_vm8 = vcmp.eq.s32.totalorder %v1222_v40, 2  ;;  %v1226_v21 = vsel %vm1225_vm12, %v1935_v9, 0.0 }
 0x1ac   : > { %v1160_v48 = vadd.f32 %v1469_v34, %v1133_v43  ;;  %v1161_v26 = vadd.f32 %v1470_v37, %v1134_v47 }
 0x1ad   : > { %v1473_v27 = vadd.f32 -127.5, %v1167_v44  ;;  %v1474_v0 = vadd.f32 -127.5, %v1173_v46 }
 0x1ae   : > { %v1174_v50 = vrot.slane %v1160_v48, 4  ;;  %v1180_v51 = vrot.slane %v1161_v26, 4 }
 0x1af   : > { %v1200_v29 = vmul.f32 %v1473_v27, %v1473_v27  ;;  %v1201_v7 = vmul.f32 %v1474_v0, %v1474_v0 }
 0x1b0   : > { %v1175_v30 = vadd.f32 %v1174_v50, %v1160_v48  ;;  %v1181_v8 = vadd.f32 %v1180_v51, %v1161_v26 }
 0x1b1   : > { %v1202_v52 = vadd.f32 %v1201_v7, %v1200_v29 }
 0x1b2   : > { %v1176_v54 = vrot.slane %v1175_v30, 2  ;;  %v1182_v55 = vrot.slane %v1181_v8, 2 }
 0x1b3   : > { %1203 = vadd.xlane.f32.xlu2 %v1202_v52 }
 0x1b4   : > { %v1177_v11 = vadd.f32 %v1176_v54, %v1175_v30  ;;  %v1183_v57 = vadd.f32 %v1182_v55, %v1181_v8 }
 0x1b6   : > { %v1178_v58 = vrot.slane %v1177_v11, 1  ;;  %v1184_v62 = vrot.slane %v1183_v57, 1 }
 0x1b8   : > { %v1179_v2 = vadd.f32 %v1178_v58, %v1177_v11  ;;  %v1185_v1 = vadd.f32 %v1184_v62, %v1183_v57 }
 0x1ba   : > { %v1471_v10 = vadd.f32 -127.5, %v1179_v2  ;;  %v1472_v3 = vadd.f32 -127.5, %v1185_v1 }
 0x1bc   : > { %v1195_v16 = vmul.f32 %v1471_v10, %v1471_v10  ;;  %v1196_v18 = vmul.f32 %v1472_v3, %v1472_v3  ;;  %v1190_v14 = vmul.f32 %v1473_v27, %v1471_v10  ;;  %v1191_v19 = vmul.f32 %v1474_v0, %v1472_v3 }
 0x1be   : > { %v1197_v45 = vadd.f32 %v1196_v18, %v1195_v16  ;;  %v1192_v56 = vadd.f32 %v1191_v19, %v1190_v14 }
 0x1c0   : > { %1198 = vadd.xlane.f32.xlu1 %v1197_v45  ;;  %1193 = vadd.xlane.f32.xlu0 %v1192_v56 }
 0x226   : > { %v1204_v5 = vpop.xlane.xlu2 %1203 }
 0x233   : > { %v1199_v28 = vpop.xlane.xlu1 %1198  ;;  %v1194_v60 = vpop.xlane.xlu0 %1193 }
 0x234   : > { %v1205_v63 = vmul.f32 %v1204_v5, %v1199_v28 }
 0x236   : > { %1525 = vrsqrt.f32 %v1205_v63  ;;  %vm1212_vm0 = vweird.f32 %v1205_v63 }
 0x23c   : > { %v1526_v6 = vpop.eup %1525 }
 0x23d   : > { %v1207_v23 = vmul.f32 %v1526_v6, %v1205_v63  ;;  %vm1213_vm6 = vweird.f32 %v1526_v6 }
 0x23e   : > { %vm1214_vm7 = vmor %vm1212_vm0, %vm1213_vm6 }
 0x23f   : > { %v1208_v49 = vmul.f32 %v1526_v6, %v1207_v23 }
 0x241   : > { %v1209_v12 = vmul.f32 0.5, %v1208_v49 }
 0x243   : > { %v1210_v24 = vsub.f32 1.5, %v1209_v12 }
 0x245   : > { %v1211_v25 = vmul.f32 %v1526_v6, %v1210_v24 }
 0x247   : > { %v1215_v13 = vsel %vm1214_vm7, %v1526_v6, %v1211_v25 }
 0x248   : > { %v1216_v4 = vmul.f32 %v1215_v13, %v1194_v60 }
 0x24a   : > { %v1219_v61 = vadd.f32 %v1218_v31, %v1216_v4  ;;  %v1229_v59 = vsel %vm1228_vm8, %v1216_v4, 0.0 }
 0x24c   : > { %v1220_v35 = vsub.f32 %v1217_v33, %v1219_v61 }
 0x24e   : > { %v1224_v17 = vsel %vm1223_vm13, %v1220_v35, 0.0 }
 0x24f   : > { %v1227_v22 = vadd.f32 %v1226_v21, %v1224_v17 }
 0x251   : > { %v1230_v32 = vadd.f32 %v1229_v59, %v1227_v22 }
 0x253   : > { %1231 = vst [vmem:[%s200_s27] sm:$0x1] %v1230_v32 }
 0x254 PF: > { %s13_s12 = sadd.s32 1, %s1533_s12  }
 0x255   : > { %p10_p4 = scmp.ge.s32.totalorder %s13_s12, 6  }
 0x257   :  { %12 = sbr.rel (!%p10_p4) target bundleno = 1 (0x1), region = 99 }

</bundles_post_ra>
